<compile_context>
chip_gen: v7x
topology: tpu7x:2x2x1
jax: 0.10.0
libtpu: 0.0.40
codegen_flags: <defaults>
</compile_context>

<pallas_src>
import functools
import math

import jax
import jax.numpy as jnp
from jax.experimental import pallas as pl
from jax.experimental.pallas import tpu as pltpu

_VMEM = pltpu.MemorySpace.VMEM


def _vspec():
    return pl.BlockSpec(memory_space=_VMEM)


def _dot_t(a, b, dtype=None):
    """a (M,K) · b (N,K) -> (M,N), contracting the LAST axis of both operands.

    PyTorch-layout weights ([out,in]) and label matrices are consumed as-is,
    so no transpose is materialized in the wrapper or the kernel.  `dtype`
    optionally down-casts the MXU operands (bf16) while accumulating in f32.
    """
    if dtype is not None:
        a = a.astype(dtype)
        b = b.astype(dtype)
    return jax.lax.dot_general(
        a, b, dimension_numbers=(((1,), (1,)), ((), ())),
        preferred_element_type=jnp.float32)


# ---------------------------------------------------------------------------
# Training kernel: classifier logits + ADNCE l2 + HeroCon l3.
# Grid = (nprog,) programs; program 0 owns l2 + the label-invariant l3 part,
# every program owns a contiguous slice of the per-label l3 loop.
# ---------------------------------------------------------------------------
def _train_kernel(counts_ref,                                   # SMEM (Lpad,)
                  cls_ref, noisy_ref, labels_ref,
                  clsw_ref, clsb_ref, mlpw_ref, mlpb_ref,
                  logits_ref, scal_ref,
                  labt_scr, ns_scr, *,
                  num_labels, labels_per_prog, temp, mu, sigma,
                  compute_l2, compute_l3, use_adnce, matmul_dtype,
                  unroll=4, cos_eps=1e-8, exp_eps=1e-15, exp_temperature=1.0):
    p = pl.program_id(0)
    cls_x = cls_ref[...]                                        # (B, H)
    B, H = cls_x.shape

    # ---------------- classifier (tiny f32 matmul; keeps logit fidelity) ----
    # TODO(synk): nn.Dropout stochastic masking not replicated (eval identity).
    logits_ref[...] = _dot_t(cls_x, clsw_ref[...]) + clsb_ref[...]

    # ---------------- per-program scalar tile: [0,0]=l2, [1,0]=l3 partial ---
    r_id = jax.lax.broadcasted_iota(jnp.int32, (8, 128), 0)
    c_id = jax.lax.broadcasted_iota(jnp.int32, (8, 128), 1)
    m_l2 = ((r_id == 0) & (c_id == 0)).astype(jnp.float32)
    m_l3 = ((r_id == 1) & (c_id == 0)).astype(jnp.float32)
    scal_ref[...] = jnp.zeros((8, 128), jnp.float32)

    if not (compute_l2 or compute_l3):
        return

    mlp_w = mlpw_ref[...]
    mlp_b = mlpb_ref[...]
    # MLPLayer(dense + tanh); bf16 MXU operands, f32 accumulation.  (Verified
    # intent: the trans-b dot_general consumes the [out,in] weight directly;
    # if a profile ever shows an XLU vxpose here, pre-transpose mlp_w host-side.)
    orig = jnp.tanh(_dot_t(cls_x, mlp_w, matmul_dtype) + mlp_b)        # (B,H)
    orig_sq = orig * orig
    orig_n_col = jnp.sqrt(jnp.sum(orig_sq, axis=1, keepdims=True))     # (B,1)
    ones_h = jnp.ones((1, H), jnp.float32)

    # ---------------- l2 : cosine-sim/temp + ADNCE (program 0 only) ---------
    if compute_l2:
        @pl.when(p == 0)
        def _l2():
            noisy = jnp.tanh(
                _dot_t(noisy_ref[...], mlp_w, matmul_dtype) + mlp_b)   # (B,H)
            noisy_n_row = jnp.sqrt(_dot_t(ones_h, noisy * noisy))      # (1,B)
            # f32 numerator: temp=0.05 amplifies bf16 error; matmul is tiny.
            num = _dot_t(orig, noisy)                                  # (B,B)
            # nn.CosineSimilarity: clamp each norm separately at eps.
            den = (jnp.maximum(orig_n_col, cos_eps)
                   * jnp.maximum(noisy_n_row, cos_eps))
            cos_sim = num / den / temp
            eye = (jax.lax.broadcasted_iota(jnp.int32, (B, B), 0)
                   == jax.lax.broadcasted_iota(jnp.int32, (B, B), 1)
                   ).astype(jnp.float32)
            diag = jnp.sum(cos_sim * eye, axis=1, keepdims=True)       # (B,1)
            if use_adnce:
                neg_score = cos_sim * temp
                w = (1.0 / (sigma * math.sqrt(2.0 * math.pi))) * jnp.exp(
                    -((neg_score - mu) ** 2) / (2.0 * sigma * sigma))
                w = w / jnp.mean(w, axis=-1, keepdims=True)
                neg = jnp.sum(jnp.exp(cos_sim) * w, axis=1, keepdims=True)
                # -mean(log(exp(diag)/neg)) == -mean(diag - log(neg))
                l2 = -jnp.sum(diag - jnp.log(neg), axis=0,
                              keepdims=True) / float(B)                # (1,1)
            else:
                # CrossEntropyLoss(cos_sim, arange(B)) fallback.
                m = jnp.max(cos_sim, axis=1, keepdims=True)
                lse = m + jnp.log(jnp.sum(jnp.exp(cos_sim - m), axis=1,
                                          keepdims=True))
                l2 = jnp.sum(lse - diag, axis=0, keepdims=True) / float(B)
            scal_ref[...] += m_l2 * l2

    # ---------------- l3 : HeroCon supervised contrastive loss --------------
    # NOTE: loss accumulation is f32 vs. the reference's f64.
    if compute_l3:
        labels = labels_ref[...]                                       # (B,L)
        L = labels.shape[1]

        # exp_cosine_sim(orig, orig); f32 numerator (small matmul).
        orig_n_row = jnp.sqrt(_dot_t(ones_h, orig_sq))                 # (1,B)
        s = jnp.exp(_dot_t(orig, orig)
                    / (jnp.maximum(orig_n_col * orig_n_row, exp_eps)
                       * exp_temperature))                             # (B,B)

        # hamming = rowsum ⊕ rowsumᵀ − 2·L·Lᵀ  (single matmul; exact in f32).
        g = _dot_t(labels, labels)                                     # (B,B)
        ones_l = jnp.ones((1, L), jnp.float32)
        rs_col = jnp.sum(labels, axis=1, keepdims=True)                # (B,1)
        rs_row = _dot_t(ones_l, labels)                                # (1,B)
        d = rs_col + rs_row - 2.0 * g

        pos_dis = s * (1.0 - d * (1.0 / num_labels))                   # (B,B)
        sd = s * d                                                     # (B,B)

        # labelsᵀ via an MXU identity matmul (no XLU transpose).
        eye_l = (jax.lax.broadcasted_iota(jnp.int32, (L, L), 0)
                 == jax.lax.broadcasted_iota(jnp.int32, (L, L), 1)
                 ).astype(jnp.float32)
        lab_t = _dot_t(eye_l, labels)                                  # (L,B)
        # Per-label negative sums for ALL labels in one matmul:
        #   ns_all[i, a] = Σ_k (1 - labels[k,i]) · (S·D)[a, k]
        ns_all = _dot_t(1.0 - lab_t, sd)                               # (L,B)
        labt_scr[...] = lab_t
        ns_scr[...] = ns_all

        # Label-invariant part: Σ_i 1[cnt>0]·(-Σ_{pos×pos} log(pos_dis)/cnt²
        #                                      - log(|neg|+1)); program 0 only.
        @pl.when(p == 0)
        def _const():
            # Inside the pos×pos mask pos_dis > 0 (shared label ⇒ D < L);
            # the clamp only protects un-masked entries feeding the matmul.
            log_pd = jnp.log(jnp.maximum(pos_dis, 1e-30))              # (B,B)
            a_mat = _dot_t(lab_t, log_pd)                              # (L,B)
            t2 = jnp.sum(lab_t * a_mat, axis=1, keepdims=True)         # (L,1)
            cnt = jnp.sum(lab_t, axis=1, keepdims=True)                # (L,1)
            safe_cnt = jnp.maximum(cnt, 1.0)
            size = (float(B) - cnt) + 1.0                              # |neg|+1
            const_vec = jnp.where(cnt > 0.5,
                                  -t2 / (safe_cnt * safe_cnt) - jnp.log(size),
                                  0.0)
            const = jnp.sum(const_vec, axis=0, keepdims=True)          # (1,1)
            scal_ref[...] += m_l3 * const

        # Per-label log(denominator): only this program's label slice; labels
        # without positives are skipped entirely (SMEM count + pl.when).
        lane_l = jax.lax.broadcasted_iota(jnp.int32, (1, L), 1)
        base = p * labels_per_prog

        def body(j, carry):
            i = base + j
            cnt_i = counts_ref[i]

            @pl.when(cnt_i > 0)
            def _label():
                sel_c = (lane_l == i).astype(jnp.float32)              # (1,L)
                pos_col = jnp.sum(labels * sel_c, axis=1, keepdims=True)  # (B,1)
                pos_row = labt_scr[pl.ds(i, 1), :]                     # (1,B)
                ns_row = ns_scr[pl.ds(i, 1), :]                        # (1,B)
                # Negative sum is attached to the column index; the masked
                # double sum equals the reference's row-attached form because
                # pos_dis is symmetric.
                log_den = jnp.log(jnp.maximum(ns_row + pos_dis, 1e-30))  # (B,B)
                v = jnp.sum(pos_row * log_den, axis=1, keepdims=True)  # (B,1)
                t1 = jnp.sum(pos_col * v, axis=0, keepdims=True)       # (1,1)
                pf = cnt_i.astype(jnp.float32)
                scal_ref[...] += m_l3 * (t1 / (pf * pf))
            return carry

        if labels_per_prog <= max(8, unroll):
            # Small trip count: straight-line unroll at trace time.
            for j in range(labels_per_prog):
                body(j, 0)
        else:
            # Bounded partial unroll to avoid code-size / vreg-spill blow-up.
            jax.lax.fori_loop(0, labels_per_prog, body, 0, unroll=unroll)


# ---------------------------------------------------------------------------
# Lean eval kernel: logits only (no MLP weights / labels DMA, no loss stores).
# ---------------------------------------------------------------------------
def _eval_kernel(cls_ref, clsw_ref, clsb_ref, logits_ref):
    # TODO(synk): nn.Dropout stochastic masking not replicated (eval identity).
    # NOTE(v5e): num_labels << 128 makes this a lane-sparse store; pad to 128
    # inside the kernel if vst.msk ever shows up in profiles (tiny here).
    logits_ref[...] = _dot_t(cls_ref[...], clsw_ref[...]) + clsb_ref[...]


# ---------------------------------------------------------------------------
# Chip-aware helpers.
# ---------------------------------------------------------------------------
def _vmem_limit_bytes(b, h, l):
    try:
        cap = int(pltpu.get_tpu_info().vmem_capacity_bytes)
    except Exception:
        cap = 128 * 1024 * 1024
    # Leave headroom for Mosaic internal scratch / IO double buffers:
    # ~78% of 64 MiB chips (v7x), ~85% of 128 MiB chips (v5e/v6e).
    frac = 0.85 if cap >= 96 * 1024 * 1024 else 0.78
    hard_cap = int(cap * frac)
    n_f32 = (14 * b * b + 10 * b * h + 2 * h * h
             + 8 * l * b + 4 * l * h + 4 * l * l)
    need = 4 * 4 * n_f32                         # 4x headroom for temporaries
    return int(min(hard_cap, max(32 * 1024 * 1024, need)))


def _num_tensorcores():
    """2 TensorCores per chip on v7x / v5p / v4 megacore, else 1."""
    try:
        kind = jax.devices()[0].device_kind.lower()
    except Exception:
        return 1
    if "v7" in kind or "tpu7" in kind or "v5p" in kind:
        return 2
    if "v4" in kind and "lite" not in kind:
        return 2
    return 1


# ---------------------------------------------------------------------------
# Forward pass (default args: sup_contrastive_mode='HeroCon', focusing=0,
# clipping=0).
# ---------------------------------------------------------------------------
def bert_herocon_forward(params, cfg, last_hidden_state,
                         noisy_last_hidden_state, labels, training=False,
                         matmul_dtype=jnp.bfloat16):
    # TODO(synk): pretrained HuggingFace BERT encoder (AutoModel/AutoAdapterModel)
    # is not replicated; the two stochastic BERT passes are provided as inputs.
    # TODO(synk): clipping / focusing / 'WeighCon' branches (non-default forward
    # arguments) are not implemented.
    cls = last_hidden_state[:, 0, :].astype(jnp.float32)         # (B, H)
    b, h = cls.shape
    labels = labels.astype(jnp.float32)
    nl = labels.shape[1]

    compute_l2 = bool(training) and cfg["cl_alpha"] != 0
    compute_l3 = bool(training) and cfg["cl_beta"] != 0
    use_adnce = cfg["adnce_w1"] > 0 and cfg["adnce_w2"] > 0

    clsw = params["classifier_w"]
    clsb = params["classifier_b"].reshape(1, -1)

    if not (compute_l2 or compute_l3):
        # Lean eval spec: logits only.
        logits = pl.pallas_call(
            _eval_kernel,
            out_shape=jax.ShapeDtypeStruct((b, nl), jnp.float32),
            in_specs=[_vspec(), _vspec(), _vspec()],
            out_specs=_vspec(),
        )(cls, clsw, clsb)
        zero = jnp.zeros((), jnp.float32)
        return [cfg["cl_alpha"] * zero, cfg["cl_beta"] * zero], logits

    if compute_l2:
        noisy_cls = noisy_last_hidden_state[:, 0, :].astype(jnp.float32)
    else:
        noisy_cls = cls                      # tiny dead operand, never read

    # Megacore split of the per-label l3 loop (v7x/v5p/v4); no-op on v5e/v6e.
    nprog = _num_tensorcores() if compute_l3 else 1
    if nl < 2 or b % 8 != 0:
        nprog = 1
    lb = -(-nl // nprog)                     # labels per program (ceil)
    lpad = lb * nprog
    counts = jnp.sum((labels > 0.5).astype(jnp.int32), axis=0)   # (nl,)
    if lpad > nl:
        counts = jnp.concatenate(
            [counts, jnp.zeros((lpad - nl,), jnp.int32)])

    kernel = functools.partial(
        _train_kernel,
        num_labels=cfg["num_labels"], labels_per_prog=lb,
        temp=cfg["temp"], mu=cfg["adnce_w1"], sigma=cfg["adnce_w2"],
        compute_l2=compute_l2, compute_l3=compute_l3, use_adnce=use_adnce,
        matmul_dtype=matmul_dtype, unroll=4)

    # TODO(synk): add B-row tiling over the (B,B) intermediates once a single
    # tile no longer fits the chip's VMEM (B ≈ 900 on v7x, ≈ 1300 on v5e/v6e).
    grid_spec = pltpu.PrefetchScalarGridSpec(
        num_scalar_prefetch=1,
        grid=(nprog,),
        in_specs=[
            pl.BlockSpec((b, h), lambda p, c: (0, 0)),      # cls
            pl.BlockSpec((b, h), lambda p, c: (0, 0)),      # noisy cls
            pl.BlockSpec((b, nl), lambda p, c: (0, 0)),     # labels
            pl.BlockSpec((nl, h), lambda p, c: (0, 0)),     # classifier_w
            pl.BlockSpec((1, nl), lambda p, c: (0, 0)),     # classifier_b
            pl.BlockSpec((h, h), lambda p, c: (0, 0)),      # mlp_w
            pl.BlockSpec((1, h), lambda p, c: (0, 0)),      # mlp_b
        ],
        out_specs=(
            pl.BlockSpec((b, nl), lambda p, c: (p, 0)),     # logits (per prog)
            pl.BlockSpec((8, 128), lambda p, c: (p, 0)),    # [l2,l3] partials
        ),
        scratch_shapes=[pltpu.VMEM((nl, b), jnp.float32),   # labelsᵀ
                        pltpu.VMEM((nl, b), jnp.float32)],  # per-label neg sums
    )

    logits_all, scal = pl.pallas_call(
        kernel,
        out_shape=(jax.ShapeDtypeStruct((nprog * b, nl), jnp.float32),
                   jax.ShapeDtypeStruct((nprog * 8, 128), jnp.float32)),
        grid_spec=grid_spec,
        compiler_params=pltpu.CompilerParams(
            dimension_semantics=("parallel",),
            vmem_limit_bytes=_vmem_limit_bytes(b, h, nl)),
    )(counts, cls, noisy_cls, labels, clsw, clsb,
      params["mlp_w"], params["mlp_b"].reshape(1, -1))

    logits = logits_all[:b]
    scal = scal.reshape(nprog, 8, 128)
    l2 = scal[0, 0, 0]
    l3 = jnp.sum(scal[:, 1, 0])
    return [cfg["cl_alpha"] * l2, cfg["cl_beta"] * l3], logits


# ---------------------------------------------------------------------------
# Deterministic parameter init (PyTorch nn.Linear default: U(±1/sqrt(fan_in)))
# ---------------------------------------------------------------------------
def init_linear(key, out_dim, in_dim):
    kw, kb = jax.random.split(key)
    bound = 1.0 / math.sqrt(in_dim)
    w = jax.random.uniform(kw, (out_dim, in_dim), jnp.float32, -bound, bound)
    b = jax.random.uniform(kb, (out_dim,), jnp.float32, -bound, bound)
    return w, b


if __name__ == "__main__":
    B, S, H, L = 8, 8, 32, 4    # batch, seq, hidden, num_labels
    cfg = dict(cl_alpha=1.0, cl_beta=1.0, temp=0.05,
               adnce_w1=1.0, adnce_w2=0.5, num_labels=L,
               bert_dropout=0.1, clip=0.95)

    key = jax.random.PRNGKey(0)
    k_hid, k_noise, k_lab, k_cls, k_mlp = jax.random.split(key, 5)

    last_hidden = jax.random.normal(k_hid, (B, S, H), jnp.float32)
    # second stochastic BERT view (internal dropout) -> small perturbation
    noisy_hidden = last_hidden + 0.05 * jax.random.normal(
        k_noise, (B, S, H), jnp.float32)
    labels = (jax.random.uniform(k_lab, (B, L)) > 0.5).astype(jnp.float32)

    cw, cb = init_linear(k_cls, L, H)        # classifier: Linear(H, num_labels)
    mw, mb = init_linear(k_mlp, H, H)        # MLPLayer.dense: Linear(H, H)
    params = {"classifier_w": cw, "classifier_b": cb,
              "mlp_w": mw, "mlp_b": mb}

    # training path: one fused pallas_call producing logits, l2, l3
    losses, logits = bert_herocon_forward(
        params, cfg, last_hidden, noisy_hidden, labels, training=True)
    jax.block_until_ready(logits)
    jax.block_until_ready(losses[0])
    jax.block_until_ready(losses[1])

    # eval path: lean kernel (classifier only)
    eval_losses, eval_logits = bert_herocon_forward(
        params, cfg, last_hidden, noisy_hidden, labels, training=False)
    jax.block_until_ready(eval_logits)

    print("KERNEL_OK")
</pallas_src>

<mosaic_0001>
module attributes {stable_mosaic.version = 11 : i64} {
  func.func @_train_kernel(%arg0: i32, %arg1: memref<4xi32, #tpu.memory_space<smem>>, %arg2: memref<8x32xf32, #tpu.memory_space<vmem>>, %arg3: memref<8x32xf32, #tpu.memory_space<vmem>>, %arg4: memref<8x4xf32, #tpu.memory_space<vmem>>, %arg5: memref<4x32xf32, #tpu.memory_space<vmem>>, %arg6: memref<1x4xf32, #tpu.memory_space<vmem>>, %arg7: memref<32x32xf32, #tpu.memory_space<vmem>>, %arg8: memref<1x32xf32, #tpu.memory_space<vmem>>, %arg9: memref<8x4xf32, #tpu.memory_space<vmem>>, %arg10: memref<8x128xf32, #tpu.memory_space<vmem>>, %arg11: memref<4x8xf32, #tpu.memory_space<vmem>>, %arg12: memref<4x8xf32, #tpu.memory_space<vmem>>) attributes {dimension_semantics = [#tpu.dimension_semantics<parallel>], iteration_bounds = array<i64: 1>, scalar_prefetch = 1 : i64, scratch_operands = 2 : i64, tpu.core_type = #tpu.core_type<tc>, window_params = [{pipeline_mode = #tpu.pipeline_mode<synchronous>, transform_indices = @transform_0, window_bounds = array<i64: 8, 32>}, {pipeline_mode = #tpu.pipeline_mode<synchronous>, transform_indices = @transform_1, window_bounds = array<i64: 8, 32>}, {pipeline_mode = #tpu.pipeline_mode<synchronous>, transform_indices = @transform_2, window_bounds = array<i64: 8, 4>}, {pipeline_mode = #tpu.pipeline_mode<synchronous>, transform_indices = @transform_3, window_bounds = array<i64: 4, 32>}, {pipeline_mode = #tpu.pipeline_mode<synchronous>, transform_indices = @transform_4, window_bounds = array<i64: 1, 4>}, {pipeline_mode = #tpu.pipeline_mode<synchronous>, transform_indices = @transform_5, window_bounds = array<i64: 32, 32>}, {pipeline_mode = #tpu.pipeline_mode<synchronous>, transform_indices = @transform_6, window_bounds = array<i64: 1, 32>}, {transform_indices = @transform_7, window_bounds = array<i64: 8, 4>}, {transform_indices = @transform_8, window_bounds = array<i64: 8, 128>}]} {
    %c0 = arith.constant 0 : index
    %c0_0 = arith.constant 0 : index
    %0 = vector.load %arg2[%c0, %c0_0] : memref<8x32xf32, #tpu.memory_space<vmem>>, vector<8x32xf32>
    %c0_1 = arith.constant 0 : index
    %c0_2 = arith.constant 0 : index
    %1 = vector.load %arg5[%c0_1, %c0_2] : memref<4x32xf32, #tpu.memory_space<vmem>>, vector<4x32xf32>
    %cst = arith.constant dense<0.000000e+00> : vector<8x4xf32>
    %2 = tpu.matmul %0, %1, %cst {dimension_numbers = #tpu.dot_dimension_numbers<[1], [1], [0], [0], [0, 0, 1, 0], [], []>} : vector<8x32xf32>, vector<4x32xf32>, vector<8x4xf32> -> vector<8x4xf32>
    %c0_3 = arith.constant 0 : index
    %c0_4 = arith.constant 0 : index
    %3 = vector.load %arg6[%c0_3, %c0_4] : memref<1x4xf32, #tpu.memory_space<vmem>>, vector<1x4xf32>
    %4 = vector.broadcast %3 : vector<1x4xf32> to vector<8x4xf32>
    %5 = arith.addf %2, %4 : vector<8x4xf32>
    %c0_5 = arith.constant 0 : index
    %c0_6 = arith.constant 0 : index
    %6 = vector.load %arg9[%c0_5, %c0_6] : memref<8x4xf32, #tpu.memory_space<vmem>>, vector<8x4xf32>
    tpu.vector_store %arg9[%c0_5, %c0_6], %5 {strides = array<i32>} : memref<8x4xf32, #tpu.memory_space<vmem>>, vector<8x4xf32>,
    %7 = tpu.iota {dimensions = array<i32: 0>} : vector<8x128xi32>
    %8 = tpu.iota {dimensions = array<i32: 1>} : vector<8x128xi32>
    %c0_i32 = arith.constant 0 : i32
    %9 = vector.broadcast %c0_i32 : i32 to vector<8x128xi32>
    %10 = arith.cmpi eq, %7, %9 : vector<8x128xi32>
    %c0_i32_7 = arith.constant 0 : i32
    %11 = vector.broadcast %c0_i32_7 : i32 to vector<8x128xi32>
    %12 = arith.cmpi eq, %8, %11 : vector<8x128xi32>
    %13 = arith.andi %10, %12 : vector<8x128xi1>
    %14 = arith.extui %13 : vector<8x128xi1> to vector<8x128xi32>
    %15 = arith.sitofp %14 : vector<8x128xi32> to vector<8x128xf32>
    %c1_i32 = arith.constant 1 : i32
    %16 = vector.broadcast %c1_i32 : i32 to vector<8x128xi32>
    %17 = arith.cmpi eq, %7, %16 : vector<8x128xi32>
    %c0_i32_8 = arith.constant 0 : i32
    %18 = vector.broadcast %c0_i32_8 : i32 to vector<8x128xi32>
    %19 = arith.cmpi eq, %8, %18 : vector<8x128xi32>
    %20 = arith.andi %17, %19 : vector<8x128xi1>
    %21 = arith.extui %20 : vector<8x128xi1> to vector<8x128xi32>
    %22 = arith.sitofp %21 : vector<8x128xi32> to vector<8x128xf32>
    %cst_9 = arith.constant 0.000000e+00 : f32
    %23 = vector.broadcast %cst_9 : f32 to vector<8x128xf32>
    %c0_10 = arith.constant 0 : index
    %c0_11 = arith.constant 0 : index
    %24 = vector.load %arg10[%c0_10, %c0_11] : memref<8x128xf32, #tpu.memory_space<vmem>>, vector<8x128xf32>
    tpu.vector_store %arg10[%c0_10, %c0_11], %23 {strides = array<i32>} : memref<8x128xf32, #tpu.memory_space<vmem>>, vector<8x128xf32>,
    %c0_12 = arith.constant 0 : index
    %c0_13 = arith.constant 0 : index
    %25 = vector.load %arg7[%c0_12, %c0_13] : memref<32x32xf32, #tpu.memory_space<vmem>>, vector<32x32xf32>
    %c0_14 = arith.constant 0 : index
    %c0_15 = arith.constant 0 : index
    %26 = vector.load %arg8[%c0_14, %c0_15] : memref<1x32xf32, #tpu.memory_space<vmem>>, vector<1x32xf32>
    %27 = arith.truncf %0 : vector<8x32xf32> to vector<8x32xbf16>
    %28 = arith.truncf %25 : vector<32x32xf32> to vector<32x32xbf16>
    %cst_16 = arith.constant dense<0.000000e+00> : vector<8x32xf32>
    %29 = tpu.matmul %27, %28, %cst_16 {dimension_numbers = #tpu.dot_dimension_numbers<[1], [1], [0], [0], [0, 0, 1, 0], [], []>} : vector<8x32xbf16>, vector<32x32xbf16>, vector<8x32xf32> -> vector<8x32xf32>
    %30 = vector.broadcast %26 : vector<1x32xf32> to vector<8x32xf32>
    %31 = arith.addf %29, %30 : vector<8x32xf32>
    %32 = math.tanh %31 : vector<8x32xf32>
    %33 = arith.mulf %32, %32 : vector<8x32xf32>
    %cst_17 = arith.constant dense<0.000000e+00> : vector<8xf32>
    %34 = vector.multi_reduction <add>, %33, %cst_17 [1] : vector<8x32xf32> to vector<8xf32>
    %35 = vector.shape_cast %34 : vector<8xf32> to vector<8x1xf32>
    %36 = math.sqrt %35 : vector<8x1xf32>
    %cst_18 = arith.constant 1.000000e+00 : f32
    %37 = vector.broadcast %cst_18 : f32 to vector<1x32xf32>
    %c0_i32_19 = arith.constant 0 : i32
    %38 = arith.cmpi eq, %arg0, %c0_i32_19 : i32
    %39 = arith.extui %38 : i1 to i32
    %c0_i32_20 = arith.constant 0 : i32
    %40 = arith.cmpi ne, %39, %c0_i32_20 : i32
    scf.if %40 {
      %c0_53 = arith.constant 0 : index
      %c0_54 = arith.constant 0 : index
      %111 = vector.load %arg3[%c0_53, %c0_54] : memref<8x32xf32, #tpu.memory_space<vmem>>, vector<8x32xf32>
      %112 = arith.truncf %111 : vector<8x32xf32> to vector<8x32xbf16>
      %113 = arith.truncf %25 : vector<32x32xf32> to vector<32x32xbf16>
      %cst_55 = arith.constant dense<0.000000e+00> : vector<8x32xf32>
      %114 = tpu.matmul %112, %113, %cst_55 {dimension_numbers = #tpu.dot_dimension_numbers<[1], [1], [0], [0], [0, 0, 1, 0], [], []>} : vector<8x32xbf16>, vector<32x32xbf16>, vector<8x32xf32> -> vector<8x32xf32>
      %115 = vector.broadcast %26 : vector<1x32xf32> to vector<8x32xf32>
      %116 = arith.addf %114, %115 : vector<8x32xf32>
      %117 = math.tanh %116 : vector<8x32xf32>
      %118 = arith.mulf %117, %117 : vector<8x32xf32>
      %cst_56 = arith.constant dense<0.000000e+00> : vector<1x8xf32>
      %119 = tpu.matmul %37, %118, %cst_56 {dimension_numbers = #tpu.dot_dimension_numbers<[1], [1], [0], [0], [0, 0, 1, 0], [], []>} : vector<1x32xf32>, vector<8x32xf32>, vector<1x8xf32> -> vector<1x8xf32>
      %120 = math.sqrt %119 : vector<1x8xf32>
      %cst_57 = arith.constant dense<0.000000e+00> : vector<8x8xf32>
      %121 = tpu.matmul %32, %117, %cst_57 {dimension_numbers = #tpu.dot_dimension_numbers<[1], [1], [0], [0], [0, 0, 1, 0], [], []>} : vector<8x32xf32>, vector<8x32xf32>, vector<8x8xf32> -> vector<8x8xf32>
      %cst_58 = arith.constant 9.99999993E-9 : f32
      %122 = vector.broadcast %cst_58 : f32 to vector<8x1xf32>
      %123 = arith.maximumf %36, %122 : vector<8x1xf32>
      %cst_59 = arith.constant 9.99999993E-9 : f32
      %124 = vector.broadcast %cst_59 : f32 to vector<1x8xf32>
      %125 = arith.maximumf %120, %124 : vector<1x8xf32>
      %126 = vector.broadcast %123 : vector<8x1xf32> to vector<8x8xf32>
      %127 = vector.broadcast %125 : vector<1x8xf32> to vector<8x8xf32>
      %128 = arith.mulf %126, %127 : vector<8x8xf32>
      %129 = arith.divf %121, %128 : vector<8x8xf32>
      %cst_60 = arith.constant 5.000000e-02 : f32
      %130 = vector.broadcast %cst_60 : f32 to vector<8x8xf32>
      %131 = arith.divf %129, %130 : vector<8x8xf32>
      %132 = tpu.iota {dimensions = array<i32: 0>} : vector<8x8xi32>
      %133 = tpu.iota {dimensions = array<i32: 1>} : vector<8x8xi32>
      %134 = arith.cmpi eq, %132, %133 : vector<8x8xi32>
      %135 = arith.extui %134 : vector<8x8xi1> to vector<8x8xi32>
      %136 = arith.sitofp %135 : vector<8x8xi32> to vector<8x8xf32>
      %137 = arith.mulf %131, %136 : vector<8x8xf32>
      %cst_61 = arith.constant dense<0.000000e+00> : vector<8xf32>
      %138 = vector.multi_reduction <add>, %137, %cst_61 [1] : vector<8x8xf32> to vector<8xf32>
      %139 = vector.shape_cast %138 : vector<8xf32> to vector<8x1xf32>
      %cst_62 = arith.constant 5.000000e-02 : f32
      %140 = vector.broadcast %cst_62 : f32 to vector<8x8xf32>
      %141 = arith.mulf %131, %140 : vector<8x8xf32>
      %cst_63 = arith.constant 1.000000e+00 : f32
      %142 = vector.broadcast %cst_63 : f32 to vector<8x8xf32>
      %143 = arith.subf %141, %142 : vector<8x8xf32>
      %144 = arith.mulf %143, %143 : vector<8x8xf32>
      %cst_64 = arith.constant 0.000000e+00 : f32
      %145 = vector.broadcast %cst_64 : f32 to vector<8x8xf32>
      %146 = arith.subf %145, %144 : vector<8x8xf32>
      %cst_65 = arith.constant 5.000000e-01 : f32
      %147 = vector.broadcast %cst_65 : f32 to vector<8x8xf32>
      %148 = arith.divf %146, %147 : vector<8x8xf32>
      %149 = math.exp %148 : vector<8x8xf32>
      %cst_66 = arith.constant 0.797884583 : f32
      %150 = vector.broadcast %cst_66 : f32 to vector<8x8xf32>
      %151 = arith.mulf %150, %149 : vector<8x8xf32>
      %cst_67 = arith.constant dense<0.000000e+00> : vector<8xf32>
      %152 = vector.multi_reduction <add>, %151, %cst_67 [1] : vector<8x8xf32> to vector<8xf32>
      %153 = vector.shape_cast %152 : vector<8xf32> to vector<8x1xf32>
      %cst_68 = arith.constant 8.000000e+00 : f32
      %154 = vector.broadcast %cst_68 : f32 to vector<8x1xf32>
      %155 = arith.divf %153, %154 : vector<8x1xf32>
      %156 = vector.broadcast %155 : vector<8x1xf32> to vector<8x8xf32>
      %157 = arith.divf %151, %156 : vector<8x8xf32>
      %158 = math.exp %131 : vector<8x8xf32>
      %159 = arith.mulf %158, %157 : vector<8x8xf32>
      %cst_69 = arith.constant dense<0.000000e+00> : vector<8xf32>
      %160 = vector.multi_reduction <add>, %159, %cst_69 [1] : vector<8x8xf32> to vector<8xf32>
      %161 = vector.shape_cast %160 : vector<8xf32> to vector<8x1xf32>
      %162 = math.log %161 : vector<8x1xf32>
      %163 = arith.subf %139, %162 : vector<8x1xf32>
      %cst_70 = arith.constant dense<0.000000e+00> : vector<1xf32>
      %164 = vector.multi_reduction <add>, %163, %cst_70 [0] : vector<8x1xf32> to vector<1xf32>
      %165 = vector.shape_cast %164 : vector<1xf32> to vector<1x1xf32>
      %cst_71 = arith.constant 0.000000e+00 : f32
      %166 = vector.broadcast %cst_71 : f32 to vector<1x1xf32>
      %167 = arith.subf %166, %165 : vector<1x1xf32>
      %cst_72 = arith.constant 8.000000e+00 : f32
      %168 = vector.broadcast %cst_72 : f32 to vector<1x1xf32>
      %169 = arith.divf %167, %168 : vector<1x1xf32>
      %c0_73 = arith.constant 0 : index
      %c0_74 = arith.constant 0 : index
      %170 = vector.load %arg10[%c0_73, %c0_74] : memref<8x128xf32, #tpu.memory_space<vmem>>, vector<8x128xf32>
      %171 = vector.broadcast %169 : vector<1x1xf32> to vector<8x128xf32>
      %172 = arith.mulf %15, %171 : vector<8x128xf32>
      %173 = arith.addf %170, %172 : vector<8x128xf32>
      %c0_75 = arith.constant 0 : index
      %c0_76 = arith.constant 0 : index
      %174 = vector.load %arg10[%c0_75, %c0_76] : memref<8x128xf32, #tpu.memory_space<vmem>>, vector<8x128xf32>
      tpu.vector_store %arg10[%c0_75, %c0_76], %173 {strides = array<i32>} : memref<8x128xf32, #tpu.memory_space<vmem>>, vector<8x128xf32>,
    } else {
    }
    %c0_21 = arith.constant 0 : index
    %c0_22 = arith.constant 0 : index
    %41 = vector.load %arg4[%c0_21, %c0_22] : memref<8x4xf32, #tpu.memory_space<vmem>>, vector<8x4xf32>
    %cst_23 = arith.constant dense<0.000000e+00> : vector<1x8xf32>
    %42 = tpu.matmul %37, %33, %cst_23 {dimension_numbers = #tpu.dot_dimension_numbers<[1], [1], [0], [0], [0, 0, 1, 0], [], []>} : vector<1x32xf32>, vector<8x32xf32>, vector<1x8xf32> -> vector<1x8xf32>
    %43 = math.sqrt %42 : vector<1x8xf32>
    %cst_24 = arith.constant dense<0.000000e+00> : vector<8x8xf32>
    %44 = tpu.matmul %32, %32, %cst_24 {dimension_numbers = #tpu.dot_dimension_numbers<[1], [1], [0], [0], [0, 0, 1, 0], [], []>} : vector<8x32xf32>, vector<8x32xf32>, vector<8x8xf32> -> vector<8x8xf32>
    %45 = vector.broadcast %36 : vector<8x1xf32> to vector<8x8xf32>
    %46 = vector.broadcast %43 : vector<1x8xf32> to vector<8x8xf32>
    %47 = arith.mulf %45, %46 : vector<8x8xf32>
    %cst_25 = arith.constant 1.000000e-15 : f32
    %48 = vector.broadcast %cst_25 : f32 to vector<8x8xf32>
    %49 = arith.maximumf %47, %48 : vector<8x8xf32>
    %cst_26 = arith.constant 1.000000e+00 : f32
    %50 = vector.broadcast %cst_26 : f32 to vector<8x8xf32>
    %51 = arith.mulf %49, %50 : vector<8x8xf32>
    %52 = arith.divf %44, %51 : vector<8x8xf32>
    %53 = math.exp %52 : vector<8x8xf32>
    %cst_27 = arith.constant dense<0.000000e+00> : vector<8x8xf32>
    %54 = tpu.matmul %41, %41, %cst_27 {dimension_numbers = #tpu.dot_dimension_numbers<[1], [1], [0], [0], [0, 0, 1, 0], [], []>} : vector<8x4xf32>, vector<8x4xf32>, vector<8x8xf32> -> vector<8x8xf32>
    %cst_28 = arith.constant 1.000000e+00 : f32
    %55 = vector.broadcast %cst_28 : f32 to vector<1x4xf32>
    %cst_29 = arith.constant dense<0.000000e+00> : vector<8xf32>
    %56 = vector.multi_reduction <add>, %41, %cst_29 [1] : vector<8x4xf32> to vector<8xf32>
    %57 = vector.shape_cast %56 : vector<8xf32> to vector<8x1xf32>
    %cst_30 = arith.constant dense<0.000000e+00> : vector<1x8xf32>
    %58 = tpu.matmul %55, %41, %cst_30 {dimension_numbers = #tpu.dot_dimension_numbers<[1], [1], [0], [0], [0, 0, 1, 0], [], []>} : vector<1x4xf32>, vector<8x4xf32>, vector<1x8xf32> -> vector<1x8xf32>
    %59 = vector.broadcast %57 : vector<8x1xf32> to vector<8x8xf32>
    %60 = vector.broadcast %58 : vector<1x8xf32> to vector<8x8xf32>
    %61 = arith.addf %59, %60 : vector<8x8xf32>
    %cst_31 = arith.constant 2.000000e+00 : f32
    %62 = vector.broadcast %cst_31 : f32 to vector<8x8xf32>
    %63 = arith.mulf %62, %54 : vector<8x8xf32>
    %64 = arith.subf %61, %63 : vector<8x8xf32>
    %cst_32 = arith.constant 2.500000e-01 : f32
    %65 = vector.broadcast %cst_32 : f32 to vector<8x8xf32>
    %66 = arith.mulf %64, %65 : vector<8x8xf32>
    %cst_33 = arith.constant 1.000000e+00 : f32
    %67 = vector.broadcast %cst_33 : f32 to vector<8x8xf32>
    %68 = arith.subf %67, %66 : vector<8x8xf32>
    %69 = arith.mulf %53, %68 : vector<8x8xf32>
    %70 = arith.mulf %53, %64 : vector<8x8xf32>
    %71 = tpu.iota {dimensions = array<i32: 0>} : vector<4x4xi32>
    %72 = tpu.iota {dimensions = array<i32: 1>} : vector<4x4xi32>
    %73 = arith.cmpi eq, %71, %72 : vector<4x4xi32>
    %74 = arith.extui %73 : vector<4x4xi1> to vector<4x4xi32>
    %75 = arith.sitofp %74 : vector<4x4xi32> to vector<4x4xf32>
    %cst_34 = arith.constant dense<0.000000e+00> : vector<4x8xf32>
    %76 = tpu.matmul %75, %41, %cst_34 {dimension_numbers = #tpu.dot_dimension_numbers<[1], [1], [0], [0], [0, 0, 1, 0], [], []>} : vector<4x4xf32>, vector<8x4xf32>, vector<4x8xf32> -> vector<4x8xf32>
    %cst_35 = arith.constant 1.000000e+00 : f32
    %77 = vector.broadcast %cst_35 : f32 to vector<4x8xf32>
    %78 = arith.subf %77, %76 : vector<4x8xf32>
    %cst_36 = arith.constant dense<0.000000e+00> : vector<4x8xf32>
    %79 = tpu.matmul %78, %70, %cst_36 {dimension_numbers = #tpu.dot_dimension_numbers<[1], [1], [0], [0], [0, 0, 1, 0], [], []>} : vector<4x8xf32>, vector<8x8xf32>, vector<4x8xf32> -> vector<4x8xf32>
    %c0_37 = arith.constant 0 : index
    %c0_38 = arith.constant 0 : index
    %80 = vector.load %arg11[%c0_37, %c0_38] : memref<4x8xf32, #tpu.memory_space<vmem>>, vector<4x8xf32>
    tpu.vector_store %arg11[%c0_37, %c0_38], %76 {strides = array<i32>} : memref<4x8xf32, #tpu.memory_space<vmem>>, vector<4x8xf32>,
    %c0_39 = arith.constant 0 : index
    %c0_40 = arith.constant 0 : index
    %81 = vector.load %arg12[%c0_39, %c0_40] : memref<4x8xf32, #tpu.memory_space<vmem>>, vector<4x8xf32>
    tpu.vector_store %arg12[%c0_39, %c0_40], %79 {strides = array<i32>} : memref<4x8xf32, #tpu.memory_space<vmem>>, vector<4x8xf32>,
    %c0_i32_41 = arith.constant 0 : i32
    %82 = arith.cmpi eq, %arg0, %c0_i32_41 : i32
    %83 = arith.extui %82 : i1 to i32
    %c0_i32_42 = arith.constant 0 : i32
    %84 = arith.cmpi ne, %83, %c0_i32_42 : i32
    scf.if %84 {
      %cst_53 = arith.constant 1.000000e-30 : f32
      %111 = vector.broadcast %cst_53 : f32 to vector<8x8xf32>
      %112 = arith.maximumf %69, %111 : vector<8x8xf32>
      %113 = math.log %112 : vector<8x8xf32>
      %cst_54 = arith.constant dense<0.000000e+00> : vector<4x8xf32>
      %114 = tpu.matmul %76, %113, %cst_54 {dimension_numbers = #tpu.dot_dimension_numbers<[1], [1], [0], [0], [0, 0, 1, 0], [], []>} : vector<4x8xf32>, vector<8x8xf32>, vector<4x8xf32> -> vector<4x8xf32>
      %115 = arith.mulf %76, %114 : vector<4x8xf32>
      %cst_55 = arith.constant dense<0.000000e+00> : vector<4xf32>
      %116 = vector.multi_reduction <add>, %115, %cst_55 [1] : vector<4x8xf32> to vector<4xf32>
      %117 = vector.shape_cast %116 : vector<4xf32> to vector<4x1xf32>
      %cst_56 = arith.constant dense<0.000000e+00> : vector<4xf32>
      %118 = vector.multi_reduction <add>, %76, %cst_56 [1] : vector<4x8xf32> to vector<4xf32>
      %119 = vector.shape_cast %118 : vector<4xf32> to vector<4x1xf32>
      %cst_57 = arith.constant 1.000000e+00 : f32
      %120 = vector.broadcast %cst_57 : f32 to vector<4x1xf32>
      %121 = arith.maximumf %119, %120 : vector<4x1xf32>
      %cst_58 = arith.constant 8.000000e+00 : f32
      %122 = vector.broadcast %cst_58 : f32 to vector<4x1xf32>
      %123 = arith.subf %122, %119 : vector<4x1xf32>
      %cst_59 = arith.constant 1.000000e+00 : f32
      %124 = vector.broadcast %cst_59 : f32 to vector<4x1xf32>
      %125 = arith.addf %123, %124 : vector<4x1xf32>
      %cst_60 = arith.constant 5.000000e-01 : f32
      %126 = vector.broadcast %cst_60 : f32 to vector<4x1xf32>
      %127 = arith.cmpf ogt, %119, %126 : vector<4x1xf32>
      %cst_61 = arith.constant 0.000000e+00 : f32
      %128 = vector.broadcast %cst_61 : f32 to vector<4x1xf32>
      %129 = arith.subf %128, %117 : vector<4x1xf32>
      %130 = arith.mulf %121, %121 : vector<4x1xf32>
      %131 = arith.divf %129, %130 : vector<4x1xf32>
      %132 = math.log %125 : vector<4x1xf32>
      %133 = arith.subf %131, %132 : vector<4x1xf32>
      %cst_62 = arith.constant 0.000000e+00 : f32
      %134 = vector.broadcast %cst_62 : f32 to vector<4x1xf32>
      %135 = arith.select %127, %133, %134 : vector<4x1xi1>, vector<4x1xf32>
      %cst_63 = arith.constant dense<0.000000e+00> : vector<1xf32>
      %136 = vector.multi_reduction <add>, %135, %cst_63 [0] : vector<4x1xf32> to vector<1xf32>
      %137 = vector.shape_cast %136 : vector<1xf32> to vector<1x1xf32>
      %c0_64 = arith.constant 0 : index
      %c0_65 = arith.constant 0 : index
      %138 = vector.load %arg10[%c0_64, %c0_65] : memref<8x128xf32, #tpu.memory_space<vmem>>, vector<8x128xf32>
      %139 = vector.broadcast %137 : vector<1x1xf32> to vector<8x128xf32>
      %140 = arith.mulf %22, %139 : vector<8x128xf32>
      %141 = arith.addf %138, %140 : vector<8x128xf32>
      %c0_66 = arith.constant 0 : index
      %c0_67 = arith.constant 0 : index
      %142 = vector.load %arg10[%c0_66, %c0_67] : memref<8x128xf32, #tpu.memory_space<vmem>>, vector<8x128xf32>
      tpu.vector_store %arg10[%c0_66, %c0_67], %141 {strides = array<i32>} : memref<8x128xf32, #tpu.memory_space<vmem>>, vector<8x128xf32>,
    } else {
    }
    %85 = tpu.iota {dimensions = array<i32: 1>} : vector<1x4xi32>
    %c4_i32 = arith.constant 4 : i32
    %86 = arith.muli %arg0, %c4_i32 : i32
    %c0_i32_43 = arith.constant 0 : i32
    %87 = arith.addi %86, %c0_i32_43 : i32
    %88 = arith.index_cast %87 : i32 to index
    %89 = memref.load %arg1[%88] : memref<4xi32, #tpu.memory_space<smem>>
    %c0_i32_44 = arith.constant 0 : i32
    %90 = arith.cmpi sgt, %89, %c0_i32_44 : i32
    %91 = arith.extui %90 : i1 to i32
    %c0_i32_45 = arith.constant 0 : i32
    %92 = arith.cmpi ne, %91, %c0_i32_45 : i32
    scf.if %92 {
      %111 = vector.broadcast %87 : i32 to vector<1x4xi32>
      %112 = arith.cmpi eq, %85, %111 : vector<1x4xi32>
      %113 = arith.extui %112 : vector<1x4xi1> to vector<1x4xi32>
      %114 = arith.sitofp %113 : vector<1x4xi32> to vector<1x4xf32>
      %115 = vector.broadcast %114 : vector<1x4xf32> to vector<8x4xf32>
      %116 = arith.mulf %41, %115 : vector<8x4xf32>
      %cst_53 = arith.constant dense<0.000000e+00> : vector<8xf32>
      %117 = vector.multi_reduction <add>, %116, %cst_53 [1] : vector<8x4xf32> to vector<8xf32>
      %118 = vector.shape_cast %117 : vector<8xf32> to vector<8x1xf32>
      %119 = arith.index_cast %87 : i32 to index
      %c0_54 = arith.constant 0 : index
      %120 = vector.load %arg11[%119, %c0_54] : memref<4x8xf32, #tpu.memory_space<vmem>>, vector<1x8xf32>
      %121 = arith.index_cast %87 : i32 to index
      %c0_55 = arith.constant 0 : index
      %122 = vector.load %arg12[%121, %c0_55] : memref<4x8xf32, #tpu.memory_space<vmem>>, vector<1x8xf32>
      %123 = vector.broadcast %122 : vector<1x8xf32> to vector<8x8xf32>
      %124 = arith.addf %123, %69 : vector<8x8xf32>
      %cst_56 = arith.constant 1.000000e-30 : f32
      %125 = vector.broadcast %cst_56 : f32 to vector<8x8xf32>
      %126 = arith.maximumf %124, %125 : vector<8x8xf32>
      %127 = math.log %126 : vector<8x8xf32>
      %128 = vector.broadcast %120 : vector<1x8xf32> to vector<8x8xf32>
      %129 = arith.mulf %128, %127 : vector<8x8xf32>
      %cst_57 = arith.constant dense<0.000000e+00> : vector<8xf32>
      %130 = vector.multi_reduction <add>, %129, %cst_57 [1] : vector<8x8xf32> to vector<8xf32>
      %131 = vector.shape_cast %130 : vector<8xf32> to vector<8x1xf32>
      %132 = arith.mulf %118, %131 : vector<8x1xf32>
      %cst_58 = arith.constant dense<0.000000e+00> : vector<1xf32>
      %133 = vector.multi_reduction <add>, %132, %cst_58 [0] : vector<8x1xf32> to vector<1xf32>
      %134 = vector.shape_cast %133 : vector<1xf32> to vector<1x1xf32>
      %135 = arith.sitofp %89 : i32 to f32
      %c0_59 = arith.constant 0 : index
      %c0_60 = arith.constant 0 : index
      %136 = vector.load %arg10[%c0_59, %c0_60] : memref<8x128xf32, #tpu.memory_space<vmem>>, vector<8x128xf32>
      %137 = arith.mulf %135, %135 : f32
      %138 = vector.broadcast %137 : f32 to vector<1x1xf32>
      %139 = arith.divf %134, %138 : vector<1x1xf32>
      %140 = vector.broadcast %139 : vector<1x1xf32> to vector<8x128xf32>
      %141 = arith.mulf %22, %140 : vector<8x128xf32>
      %142 = arith.addf %136, %141 : vector<8x128xf32>
      %c0_61 = arith.constant 0 : index
      %c0_62 = arith.constant 0 : index
      %143 = vector.load %arg10[%c0_61, %c0_62] : memref<8x128xf32, #tpu.memory_space<vmem>>, vector<8x128xf32>
      tpu.vector_store %arg10[%c0_61, %c0_62], %142 {strides = array<i32>} : memref<8x128xf32, #tpu.memory_space<vmem>>, vector<8x128xf32>,
    } else {
    }
    %c1_i32_46 = arith.constant 1 : i32
    %93 = arith.addi %86, %c1_i32_46 : i32
    %94 = arith.index_cast %93 : i32 to index
    %95 = memref.load %arg1[%94] : memref<4xi32, #tpu.memory_space<smem>>
    %c0_i32_47 = arith.constant 0 : i32
    %96 = arith.cmpi sgt, %95, %c0_i32_47 : i32
    %97 = arith.extui %96 : i1 to i32
    %c0_i32_48 = arith.constant 0 : i32
    %98 = arith.cmpi ne, %97, %c0_i32_48 : i32
    scf.if %98 {
      %111 = vector.broadcast %93 : i32 to vector<1x4xi32>
      %112 = arith.cmpi eq, %85, %111 : vector<1x4xi32>
      %113 = arith.extui %112 : vector<1x4xi1> to vector<1x4xi32>
      %114 = arith.sitofp %113 : vector<1x4xi32> to vector<1x4xf32>
      %115 = vector.broadcast %114 : vector<1x4xf32> to vector<8x4xf32>
      %116 = arith.mulf %41, %115 : vector<8x4xf32>
      %cst_53 = arith.constant dense<0.000000e+00> : vector<8xf32>
      %117 = vector.multi_reduction <add>, %116, %cst_53 [1] : vector<8x4xf32> to vector<8xf32>
      %118 = vector.shape_cast %117 : vector<8xf32> to vector<8x1xf32>
      %119 = arith.index_cast %93 : i32 to index
      %c0_54 = arith.constant 0 : index
      %120 = vector.load %arg11[%119, %c0_54] : memref<4x8xf32, #tpu.memory_space<vmem>>, vector<1x8xf32>
      %121 = arith.index_cast %93 : i32 to index
      %c0_55 = arith.constant 0 : index
      %122 = vector.load %arg12[%121, %c0_55] : memref<4x8xf32, #tpu.memory_space<vmem>>, vector<1x8xf32>
      %123 = vector.broadcast %122 : vector<1x8xf32> to vector<8x8xf32>
      %124 = arith.addf %123, %69 : vector<8x8xf32>
      %cst_56 = arith.constant 1.000000e-30 : f32
      %125 = vector.broadcast %cst_56 : f32 to vector<8x8xf32>
      %126 = arith.maximumf %124, %125 : vector<8x8xf32>
      %127 = math.log %126 : vector<8x8xf32>
      %128 = vector.broadcast %120 : vector<1x8xf32> to vector<8x8xf32>
      %129 = arith.mulf %128, %127 : vector<8x8xf32>
      %cst_57 = arith.constant dense<0.000000e+00> : vector<8xf32>
      %130 = vector.multi_reduction <add>, %129, %cst_57 [1] : vector<8x8xf32> to vector<8xf32>
      %131 = vector.shape_cast %130 : vector<8xf32> to vector<8x1xf32>
      %132 = arith.mulf %118, %131 : vector<8x1xf32>
      %cst_58 = arith.constant dense<0.000000e+00> : vector<1xf32>
      %133 = vector.multi_reduction <add>, %132, %cst_58 [0] : vector<8x1xf32> to vector<1xf32>
      %134 = vector.shape_cast %133 : vector<1xf32> to vector<1x1xf32>
      %135 = arith.sitofp %95 : i32 to f32
      %c0_59 = arith.constant 0 : index
      %c0_60 = arith.constant 0 : index
      %136 = vector.load %arg10[%c0_59, %c0_60] : memref<8x128xf32, #tpu.memory_space<vmem>>, vector<8x128xf32>
      %137 = arith.mulf %135, %135 : f32
      %138 = vector.broadcast %137 : f32 to vector<1x1xf32>
      %139 = arith.divf %134, %138 : vector<1x1xf32>
      %140 = vector.broadcast %139 : vector<1x1xf32> to vector<8x128xf32>
      %141 = arith.mulf %22, %140 : vector<8x128xf32>
      %142 = arith.addf %136, %141 : vector<8x128xf32>
      %c0_61 = arith.constant 0 : index
      %c0_62 = arith.constant 0 : index
      %143 = vector.load %arg10[%c0_61, %c0_62] : memref<8x128xf32, #tpu.memory_space<vmem>>, vector<8x128xf32>
      tpu.vector_store %arg10[%c0_61, %c0_62], %142 {strides = array<i32>} : memref<8x128xf32, #tpu.memory_space<vmem>>, vector<8x128xf32>,
    } else {
    }
    %c2_i32 = arith.constant 2 : i32
    %99 = arith.addi %86, %c2_i32 : i32
    %100 = arith.index_cast %99 : i32 to index
    %101 = memref.load %arg1[%100] : memref<4xi32, #tpu.memory_space<smem>>
    %c0_i32_49 = arith.constant 0 : i32
    %102 = arith.cmpi sgt, %101, %c0_i32_49 : i32
    %103 = arith.extui %102 : i1 to i32
    %c0_i32_50 = arith.constant 0 : i32
    %104 = arith.cmpi ne, %103, %c0_i32_50 : i32
    scf.if %104 {
      %111 = vector.broadcast %99 : i32 to vector<1x4xi32>
      %112 = arith.cmpi eq, %85, %111 : vector<1x4xi32>
      %113 = arith.extui %112 : vector<1x4xi1> to vector<1x4xi32>
      %114 = arith.sitofp %113 : vector<1x4xi32> to vector<1x4xf32>
      %115 = vector.broadcast %114 : vector<1x4xf32> to vector<8x4xf32>
      %116 = arith.mulf %41, %115 : vector<8x4xf32>
      %cst_53 = arith.constant dense<0.000000e+00> : vector<8xf32>
      %117 = vector.multi_reduction <add>, %116, %cst_53 [1] : vector<8x4xf32> to vector<8xf32>
      %118 = vector.shape_cast %117 : vector<8xf32> to vector<8x1xf32>
      %119 = arith.index_cast %99 : i32 to index
      %c0_54 = arith.constant 0 : index
      %120 = vector.load %arg11[%119, %c0_54] : memref<4x8xf32, #tpu.memory_space<vmem>>, vector<1x8xf32>
      %121 = arith.index_cast %99 : i32 to index
      %c0_55 = arith.constant 0 : index
      %122 = vector.load %arg12[%121, %c0_55] : memref<4x8xf32, #tpu.memory_space<vmem>>, vector<1x8xf32>
      %123 = vector.broadcast %122 : vector<1x8xf32> to vector<8x8xf32>
      %124 = arith.addf %123, %69 : vector<8x8xf32>
      %cst_56 = arith.constant 1.000000e-30 : f32
      %125 = vector.broadcast %cst_56 : f32 to vector<8x8xf32>
      %126 = arith.maximumf %124, %125 : vector<8x8xf32>
      %127 = math.log %126 : vector<8x8xf32>
      %128 = vector.broadcast %120 : vector<1x8xf32> to vector<8x8xf32>
      %129 = arith.mulf %128, %127 : vector<8x8xf32>
      %cst_57 = arith.constant dense<0.000000e+00> : vector<8xf32>
      %130 = vector.multi_reduction <add>, %129, %cst_57 [1] : vector<8x8xf32> to vector<8xf32>
      %131 = vector.shape_cast %130 : vector<8xf32> to vector<8x1xf32>
      %132 = arith.mulf %118, %131 : vector<8x1xf32>
      %cst_58 = arith.constant dense<0.000000e+00> : vector<1xf32>
      %133 = vector.multi_reduction <add>, %132, %cst_58 [0] : vector<8x1xf32> to vector<1xf32>
      %134 = vector.shape_cast %133 : vector<1xf32> to vector<1x1xf32>
      %135 = arith.sitofp %101 : i32 to f32
      %c0_59 = arith.constant 0 : index
      %c0_60 = arith.constant 0 : index
      %136 = vector.load %arg10[%c0_59, %c0_60] : memref<8x128xf32, #tpu.memory_space<vmem>>, vector<8x128xf32>
      %137 = arith.mulf %135, %135 : f32
      %138 = vector.broadcast %137 : f32 to vector<1x1xf32>
      %139 = arith.divf %134, %138 : vector<1x1xf32>
      %140 = vector.broadcast %139 : vector<1x1xf32> to vector<8x128xf32>
      %141 = arith.mulf %22, %140 : vector<8x128xf32>
      %142 = arith.addf %136, %141 : vector<8x128xf32>
      %c0_61 = arith.constant 0 : index
      %c0_62 = arith.constant 0 : index
      %143 = vector.load %arg10[%c0_61, %c0_62] : memref<8x128xf32, #tpu.memory_space<vmem>>, vector<8x128xf32>
      tpu.vector_store %arg10[%c0_61, %c0_62], %142 {strides = array<i32>} : memref<8x128xf32, #tpu.memory_space<vmem>>, vector<8x128xf32>,
    } else {
    }
    %c3_i32 = arith.constant 3 : i32
    %105 = arith.addi %86, %c3_i32 : i32
    %106 = arith.index_cast %105 : i32 to index
    %107 = memref.load %arg1[%106] : memref<4xi32, #tpu.memory_space<smem>>
    %c0_i32_51 = arith.constant 0 : i32
    %108 = arith.cmpi sgt, %107, %c0_i32_51 : i32
    %109 = arith.extui %108 : i1 to i32
    %c0_i32_52 = arith.constant 0 : i32
    %110 = arith.cmpi ne, %109, %c0_i32_52 : i32
    scf.if %110 {
      %111 = vector.broadcast %105 : i32 to vector<1x4xi32>
      %112 = arith.cmpi eq, %85, %111 : vector<1x4xi32>
      %113 = arith.extui %112 : vector<1x4xi1> to vector<1x4xi32>
      %114 = arith.sitofp %113 : vector<1x4xi32> to vector<1x4xf32>
      %115 = vector.broadcast %114 : vector<1x4xf32> to vector<8x4xf32>
      %116 = arith.mulf %41, %115 : vector<8x4xf32>
      %cst_53 = arith.constant dense<0.000000e+00> : vector<8xf32>
      %117 = vector.multi_reduction <add>, %116, %cst_53 [1] : vector<8x4xf32> to vector<8xf32>
      %118 = vector.shape_cast %117 : vector<8xf32> to vector<8x1xf32>
      %119 = arith.index_cast %105 : i32 to index
      %c0_54 = arith.constant 0 : index
      %120 = vector.load %arg11[%119, %c0_54] : memref<4x8xf32, #tpu.memory_space<vmem>>, vector<1x8xf32>
      %121 = arith.index_cast %105 : i32 to index
      %c0_55 = arith.constant 0 : index
      %122 = vector.load %arg12[%121, %c0_55] : memref<4x8xf32, #tpu.memory_space<vmem>>, vector<1x8xf32>
      %123 = vector.broadcast %122 : vector<1x8xf32> to vector<8x8xf32>
      %124 = arith.addf %123, %69 : vector<8x8xf32>
      %cst_56 = arith.constant 1.000000e-30 : f32
      %125 = vector.broadcast %cst_56 : f32 to vector<8x8xf32>
      %126 = arith.maximumf %124, %125 : vector<8x8xf32>
      %127 = math.log %126 : vector<8x8xf32>
      %128 = vector.broadcast %120 : vector<1x8xf32> to vector<8x8xf32>
      %129 = arith.mulf %128, %127 : vector<8x8xf32>
      %cst_57 = arith.constant dense<0.000000e+00> : vector<8xf32>
      %130 = vector.multi_reduction <add>, %129, %cst_57 [1] : vector<8x8xf32> to vector<8xf32>
      %131 = vector.shape_cast %130 : vector<8xf32> to vector<8x1xf32>
      %132 = arith.mulf %118, %131 : vector<8x1xf32>
      %cst_58 = arith.constant dense<0.000000e+00> : vector<1xf32>
      %133 = vector.multi_reduction <add>, %132, %cst_58 [0] : vector<8x1xf32> to vector<1xf32>
      %134 = vector.shape_cast %133 : vector<1xf32> to vector<1x1xf32>
      %135 = arith.sitofp %107 : i32 to f32
      %c0_59 = arith.constant 0 : index
      %c0_60 = arith.constant 0 : index
      %136 = vector.load %arg10[%c0_59, %c0_60] : memref<8x128xf32, #tpu.memory_space<vmem>>, vector<8x128xf32>
      %137 = arith.mulf %135, %135 : f32
      %138 = vector.broadcast %137 : f32 to vector<1x1xf32>
      %139 = arith.divf %134, %138 : vector<1x1xf32>
      %140 = vector.broadcast %139 : vector<1x1xf32> to vector<8x128xf32>
      %141 = arith.mulf %22, %140 : vector<8x128xf32>
      %142 = arith.addf %136, %141 : vector<8x128xf32>
      %c0_61 = arith.constant 0 : index
      %c0_62 = arith.constant 0 : index
      %143 = vector.load %arg10[%c0_61, %c0_62] : memref<8x128xf32, #tpu.memory_space<vmem>>, vector<8x128xf32>
      tpu.vector_store %arg10[%c0_61, %c0_62], %142 {strides = array<i32>} : memref<8x128xf32, #tpu.memory_space<vmem>>, vector<8x128xf32>,
    } else {
    }
    return
  }
  func.func @transform_0(%arg0: i32, %arg1: memref<4xi32, #tpu.memory_space<smem>>) -> (i32, i32) {
    %c0_i32 = arith.constant 0 : i32
    %c0_i32_0 = arith.constant 0 : i32
    %c0_i32_1 = arith.constant 0 : i32
    return %c0_i32, %c0_i32_0 : i32, i32
  }
  func.func @transform_1(%arg0: i32, %arg1: memref<4xi32, #tpu.memory_space<smem>>) -> (i32, i32) {
    %c0_i32 = arith.constant 0 : i32
    %c0_i32_0 = arith.constant 0 : i32
    %c0_i32_1 = arith.constant 0 : i32
    return %c0_i32, %c0_i32_0 : i32, i32
  }
  func.func @transform_2(%arg0: i32, %arg1: memref<4xi32, #tpu.memory_space<smem>>) -> (i32, i32) {
    %c0_i32 = arith.constant 0 : i32
    %c0_i32_0 = arith.constant 0 : i32
    %c0_i32_1 = arith.constant 0 : i32
    return %c0_i32, %c0_i32_0 : i32, i32
  }
  func.func @transform_3(%arg0: i32, %arg1: memref<4xi32, #tpu.memory_space<smem>>) -> (i32, i32) {
    %c0_i32 = arith.constant 0 : i32
    %c0_i32_0 = arith.constant 0 : i32
    %c0_i32_1 = arith.constant 0 : i32
    return %c0_i32, %c0_i32_0 : i32, i32
  }
  func.func @transform_4(%arg0: i32, %arg1: memref<4xi32, #tpu.memory_space<smem>>) -> (i32, i32) {
    %c0_i32 = arith.constant 0 : i32
    %c0_i32_0 = arith.constant 0 : i32
    %c0_i32_1 = arith.constant 0 : i32
    return %c0_i32, %c0_i32_0 : i32, i32
  }
  func.func @transform_5(%arg0: i32, %arg1: memref<4xi32, #tpu.memory_space<smem>>) -> (i32, i32) {
    %c0_i32 = arith.constant 0 : i32
    %c0_i32_0 = arith.constant 0 : i32
    %c0_i32_1 = arith.constant 0 : i32
    return %c0_i32, %c0_i32_0 : i32, i32
  }
  func.func @transform_6(%arg0: i32, %arg1: memref<4xi32, #tpu.memory_space<smem>>) -> (i32, i32) {
    %c0_i32 = arith.constant 0 : i32
    %c0_i32_0 = arith.constant 0 : i32
    %c0_i32_1 = arith.constant 0 : i32
    return %c0_i32, %c0_i32_0 : i32, i32
  }
  func.func @transform_7(%arg0: i32, %arg1: memref<4xi32, #tpu.memory_space<smem>>) -> (i32, i32) {
    %c0_i32 = arith.constant 0 : i32
    %c0_i32_0 = arith.constant 0 : i32
    return %arg0, %c0_i32 : i32, i32
  }
  func.func @transform_8(%arg0: i32, %arg1: memref<4xi32, #tpu.memory_space<smem>>) -> (i32, i32) {
    %c0_i32 = arith.constant 0 : i32
    %c0_i32_0 = arith.constant 0 : i32
    return %arg0, %c0_i32 : i32, i32
  }
}

</mosaic_0001>

<bundles_post_ra>
// kernel: tpu_custom_call.1
= control target key start
LH: loop header
LB: loop body
LE: loop exit
PB: predicated region body
PF: predicated region fallthrough
CT: control target
= control target key end

     0   :  { %s1922_s0 = inlined_call_operand.vmem [shape: s32[4], index: 0, kind: input, shape index: {}]   ;;  %s1923_s1 = inlined_call_operand.hbm [shape: f32[8,32], index: 1, kind: input, shape index: {}]   ;;  %s1924_s2 = inlined_call_operand.hbm [shape: f32[8,32], index: 2, kind: input, shape index: {}]   ;;  %s1925_s3 = inlined_call_operand.vmem [shape: f32[8,4], index: 3, kind: input, shape index: {}]   ;;  %s1926_s4 = inlined_call_operand.hbm [shape: f32[4,32], index: 4, kind: input, shape index: {}]   ;;  %s1927_s5 = inlined_call_operand.vmem [shape: f32[1,4], index: 5, kind: input, shape index: {}]   ;;  %s1928_s6 = inlined_call_operand.vmem [shape: f32[32,32], index: 6, kind: input, shape index: {}]   ;;  %s1929_s7 = inlined_call_operand.vmem [shape: f32[1,32], index: 7, kind: input, shape index: {}]   ;;  %s1930_s8 = inlined_call_operand.vmem [shape: f32[8,4], index: 8, kind: output, shape index: {0}]   ;;  %s1931_s9 = inlined_call_operand.hbm [shape: f32[8,128], index: 9, kind: output, shape index: {1}]  }
   0x1   :  { %s15_s11 = sshll.u32 %s1922_s0, 4  ;;  %s16_s11 = int_to_ptr.vmem [resolvable:$true] %s15_s11 }
   0x2   :  { %s1535_s12 = scalar_lea.vmem %s16_s11, 16  ;;  %p1540_p1 = scmp.lt.s32.totalorder %s16_s11, %s16_s11 }
   0x3   :  { %p1536_p0 = scmp.ne.s32.totalorder %s16_s11, %s1535_s12  ;;  %p1541_p2 = scmp.lt.s32.totalorder %s1535_s12, %s1535_s12 }
   0x5   :  { %p1542_p3 = por %p1541_p2, %p1540_p1 }
   0x7   :  { %p1543_p4 = pnand %p1542_p3, %p1536_p0 }
   0x9   :  { %1546 = shalt.err (!%p1543_p4)  }
   0xa   :  { %s1643_s13 = smov [#allocation5]  }
   0xb   :  { %18 = dma.vmem_to_smem %s16_s11, 16, %s1643_s13, [#allocation4] }
   0xc   :  { %1635 = dma.done.wait [#allocation4], 16 }
   0xd   :  { %1636 = vsyncadd [#allocation4], 4294967280 }
   0xe   :  { %20 = sfence }
   0xf   :  { %21 = vsyncpa [#allocation7], 0 }
  0x10   :  { %22 = vsyncpa [#allocation10], 0 }
  0x11   :  { %23 = vsyncpa [#allocation8], 0  ;;  %s1644_s14 = smov [#allocation9]   ;;  %s1645_s16 = smov [#allocation6]  }
  0x12   :  { %s40_s15 = sshll.u32 %s1644_s14, 4  ;;  %s30_s0 = sshll.u32 %s1645_s16, 4  ;;  %s41_s15 = int_to_ptr.vmem [resolvable:$true] %s40_s15  ;;  %s31_s0 = int_to_ptr.vmem [resolvable:$true] %s30_s0 }
  0x13   :  { %s1547_s19 = scalar_lea.hbm %s1924_s2, 128 }
  0x14   :  { %p1548_p5 = scmp.ne.s32.totalorder %s1924_s2, %s1547_s19  ;;  %p1551_p6 = scmp.lt.u32.totalorder %s1547_s19, %s1924_s2 }
  0x16   :  { %p1553_p7 = pnand %p1551_p6, %p1548_p5 }
  0x18   :  { %1556 = shalt.err (!%p1553_p7)
}
  0x19   :  { %s1557_s24 = scalar_lea.vmem %s41_s15, 128  ;;  %p1562_p9 = scmp.lt.s32.totalorder %s41_s15, %s41_s15 }
  0x1a   :  { %p1558_p8 = scmp.ne.s32.totalorder %s41_s15, %s1557_s24  ;;  %p1563_p10 = scmp.lt.s32.totalorder %s1557_s24, %s1557_s24 }
  0x1c   :  { %p1564_p11 = por %p1563_p10, %p1562_p9 }
  0x1e   :  { %p1565_p12 = pnand %p1564_p11, %p1558_p8 }
  0x20   :  { %1568 = shalt.err (!%p1565_p12)
}
  0x21   :  { %43 = dma.hbm_to_vmem [thread:$0]  %s1924_s2, 128, %s41_s15, [#allocation10]  }
  0x22   :  { %s1569_s29 = scalar_lea.hbm %s1923_s1, 128 }
  0x23   :  { %p1570_p13 = scmp.ne.s32.totalorder %s1923_s1, %s1569_s29  ;;  %p1573_p0 = scmp.lt.u32.totalorder %s1569_s29, %s1923_s1 }
  0x25   :  { %p1575_p1 = pnand %p1573_p0, %p1570_p13 }
  0x27   :  { %1578 = shalt.err (!%p1575_p1)
}
  0x28   :  { %s1579_s13 = scalar_lea.vmem %s31_s0, 128  ;;  %p1584_p3 = scmp.lt.s32.totalorder %s31_s0, %s31_s0 }
  0x29   :  { %p1580_p2 = scmp.ne.s32.totalorder %s31_s0, %s1579_s13  ;;  %p1585_p4 = scmp.lt.s32.totalorder %s1579_s13, %s1579_s13 }
  0x2b   :  { %p1586_p5 = por %p1585_p4, %p1584_p3 }
  0x2d   :  { %p1587_p6 = pnand %p1586_p5, %p1580_p2 }
  0x2f   :  { %1590 = shalt.err (!%p1587_p6)
}
  0x30   :  { %33 = dma.hbm_to_vmem [thread:$0]  %s1923_s1, 128, %s31_s0, [#allocation7]  }
  0x31   :  { %s1646_s15 = smov [#allocation11]   ;;  %s1591_s19 = scalar_lea.hbm %s1926_s4, 64 }
  0x32   :  { %s52_s16 = sshll.u32 %s1646_s15, 4  ;;  %p1592_p7 = scmp.ne.s32.totalorder %s1926_s4, %s1591_s19  ;;  %s53_s16 = int_to_ptr.vmem [resolvable:$true] %s52_s16 }
  0x33   :  { %p1595_p8 = scmp.lt.u32.totalorder %s1591_s19, %s1926_s4 }
  0x35   :  { %p1597_p9 = pnand %p1595_p8, %p1592_p7 }
  0x37   :  { %1600 = shalt.err (!%p1597_p9)
}
  0x38   :  { %s1601_s24 = scalar_lea.vmem %s53_s16, 64  ;;  %p1606_p11 = scmp.lt.s32.totalorder %s53_s16, %s53_s16 }
  0x39   :  { %p1602_p10 = scmp.ne.s32.totalorder %s53_s16, %s1601_s24  ;;  %p1607_p12 = scmp.lt.s32.totalorder %s1601_s24, %s1601_s24 }
  0x3b   :  { %p1608_p13 = por %p1607_p12, %p1606_p11 }
  0x3d   :  { %p1609_p0 = pnand %p1608_p13, %p1602_p10 }
  0x3f   :  { %1612 = shalt.err (!%p1609_p0)
}
  0x40   :  { %55 = dma.hbm_to_vmem [thread:$0]  %s1926_s4, 64, %s53_s16, [#allocation10]  }
  0x41   :  { %1637 = dma.done.wait [#allocation7], 128  }
  0x42   :  { %1638 = vsyncadd [#allocation7], 4294967168 }
  0x43   :  { %1639 = dma.done.wait [#allocation10], 192  }
  0x44   :  { %1640 = vsyncadd [#allocation10], 4294967104  ;;  %s1744_s25 = sld [smem:[#allocation5]]  ;;  %v1647_v0 = vmov 0.0   ;;  %vm1648_vm0 = vmmov 0   ;;  %vm81_vm1 = vcmask 261120   ;;  %v160_v34 = vlaneseq }
  0x45   :  { %1411 = vmatprep.subr.mxu0 %v1647_v0  ;;  %1413 = vmatprep.mubr.msk.f32.mxu0 %vm1648_vm0, %v1647_v0  ;;  %v73_v1 = vld [vmem:[#allocation11] sm:$0xf]  ;;  %v174_v2 = vld [vmem:[%s1928_s6] sm:$0xff]  ;;  %v72_v3 = vld [vmem:[#allocation6] sm:$0xff]  ;;  %vm158_vm2 = vcmask 31744   ;;  %v1649_v35 = vmov 1.0  }
  0x46   :  { %1416 = vmatprep.subr.bf16.mxu1 %v1647_v0  ;;  %1420 = vmatprep.mubr.msk.bf16.mxu1 %vm1648_vm0, %v1647_v0  ;;  %v175_v4 = vld [vmem:[%s1928_s6 + $0x8] sm:$0xff]  ;;  %v176_v6 = vld [vmem:[%s1928_s6 + $0x10] sm:$0xff]  ;;  %v177_v7 = vld [vmem:[%s1928_s6 + $0x18] sm:$0xff]  ;;  %v179_v12 = vpack.c.bf16 %v72_v3, %v72_v3  ;;  %v1814_v38 = vshrl.u32 %v160_v34, 7  ;;  %v1816_v39 = vand.u32 127, %v160_v34  ;;  %vm995_vm4 = vcmask 60416  }
  0x47   :  { %1412 = vmatpush3.xpose.msk.msra.mxu0 %vm81_vm1, %v73_v1  ;;  %v180_v5 = vpack.c.bf16 %v175_v4, %v174_v2  ;;  %v181_v9 = vpack.c.bf16 %v177_v7, %v176_v6  ;;  %v253_v11 = vld [vmem:[#allocation9] sm:$0xff]  ;;  %v1337_v14 = vld [vmem:[%s1927_s5] ss:$0 sm:$0xff]  ;;  %vm474_vm11 = vcmask 64512   ;;  %vm1099_vm12 = vcmask 1043456  }
  0x48   :  { %1424 = vmatprep.subr.bf16.mxu0 %v1647_v0  ;;  %v254_v13 = vpack.c.bf16 %v253_v11, %v253_v11  ;;  %v1342_v18 = vld [vmem:[%s1929_s7] ss:$0 sm:$0xff]  ;;  %vm470_vm3 = vcmp.eq.s32.totalorder %v1814_v38, %v1816_v39  ;;  %v463_v50 = vsub.s32 0, %v1814_v38  ;;  %vm165_vm14 = vcmp.eq.s32.totalorder %v1816_v39, 0 }
  0x49   :  { %v192_v8 = vsel %vm81_vm1, %v180_v5, 0  ;;  %v195_v10 = vsel %vm81_vm1, %v181_v9, 0  ;;  %v1805_v36 = vld [vmem:[%s1925_s3] sm:$0xff]  ;;  %v1841_v40 = vsel %vm470_vm3, 1.0, %v1647_v0  ;;  %vm164_vm15 = vcmp.eq.s32.totalorder %v1814_v38, 0 }
  0x4a   :  { %1414 = vmatmul.mubr.msk.f32.vlgmr.msra.gmra.mrb[0].mxu0 %vm81_vm1, %v72_v3  ;;  %1417 = vmatpush3.bf16.xpose.msra.mxu1 %v192_v8  ;;  %v755_v37 = vsel %vm158_vm2, %v1805_v36, 0.0  ;;  %p1366_p1 = scmp.le.s32.totalorder %s1744_s25, 0 }
  0x4b   :  { %1425 = vmatpush3.bf16.xpose.msra.mxu0 %v192_v8  ;;  %1418 = vmatprep.subr.bf16.mxu1 %v1647_v0  ;;  %s1152_s3 = scvt.s32.f32 (!%p1366_p1), %s1744_s25 }
  0x4c   :  { %1426 = vmatprep.subr.bf16.mxu0 %v1647_v0  ;;  %1428 = vmatprep.mubr.msk.bf16.mxu0 %vm1648_vm0, %v1647_v0 }
  0x52   :  { %1419 = vmatpush3.bf16.xpose.msra.mxu1 %v195_v10 }
  0x53   :  { %1427 = vmatpush3.bf16.xpose.msra.mxu0 %v195_v10  ;;  %1432 = vmatprep.subr.mxu1 %v1647_v0 }
  0x54   :  { %1437 = vmatprep.subr.mxu0 %v1647_v0 }
  0x59   :  { %1421 = vmatmul.mubr.msk.bf16.vlgmr.msra.gmra.mrb[0].mxu1 %vm81_vm1, %v179_v12 }
  0x5a   :  { %1429 = vmatmul.mubr.msk.bf16.vlgmr.msra.gmra.mrb[4].mxu0 %vm81_vm1, %v254_v13  ;;  %1434 = vmatprep.mubr.msk.f32.mxu1 %vm1648_vm0, %v1647_v0 }
  0x5b   :  { %1439 = vmatprep.mubr.msk.f32.mxu0 %vm1648_vm0, %v1647_v0 }
 0x11d   :  { %v154_v15 = vpop.f32.mrb[0].mxu0 }
 0x11e   :  { %v155_v16 = vadd.f32 %v1337_v14, %v154_v15  ;;  %v1415_v17 = vpop.f32.mrb[1].mxu0 }
 0x120   :  { %159 = vst.msk [vmem:[%s1930_s8] sm:$0xff] %vm158_vm2, %v155_v16  ;;  %s1154_s8 = smul.f32 (!%p1366_p1), %s1152_s3, %s1152_s3 }
 0x12c   :  { %v231_v19 = vpop.f32.mrb[0].mxu1 }
 0x12d   :  { %v292_v20 = vpop.f32.mrb[4].mxu0  ;;  %v232_v21 = vadd.f32 %v1342_v18, %v231_v19  ;;  %v1422_v24 = vpop.f32.mrb[1].mxu1 }
 0x12e   :  { %v293_v22 = vadd.f32 %v1342_v18, %v292_v20  ;;  %v1430_v23 = vpop.f32.mrb[5].mxu0  ;;  %v234_v26 = vpop.f32.mrb[2].mxu1 }
 0x12f   :  { %v295_v25 = vpop.f32.mrb[6].mxu0  ;;  %1489 = vtanh.f32 %v232_v21  ;;  %v1423_v28 = vpop.f32.mrb[3].mxu1 }
 0x130   :  { %v1431_v27 = vpop.f32.mrb[7].mxu0  ;;  %1491 = vtanh.f32 %v293_v22 }
 0x139   :  { %v1490_v29 = vpop.eup %1489 }
 0x13a   :  { %v1492_v30 = vpop.eup %1491  ;;  %v238_v31 = vmul.f32 %v1490_v29, %v1490_v29 }
 0x13b   :  { %1438 = vmatpush3.xpose.msk.msra.mxu0 %vm81_vm1, %v1492_v30  ;;  %v299_v32 = vmul.f32 %v1492_v30, %v1492_v30 }
 0x13c   :  { %v239_v33 = vsel %vm81_vm1, %v238_v31, 0.0  ;;  %1447 = vmatprep.subr.mxu0 %v1647_v0 }
 0x13d   :  { %240 = vadd.xlane.f32.xlu0 %v239_v33  ;;  %1433 = vmatpush3.xpose.msk.msra.mxu1 %vm81_vm1, %v299_v32 }
 0x13e   :  { %1440 = vmatmul.mubr.msk.f32.vlgmr.msra.gmra.mrb[2].mxu0 %vm81_vm1, %v1490_v29  ;;  %1442 = vmatprep.subr.mxu1 %v1647_v0 }
 0x13f   :  { %1448 = vmatpush3.xpose.msk.msra.mxu0 %vm81_vm1, %v1490_v29  ;;  %1449 = vmatprep.mubr.msk.f32.mxu0 %vm1648_vm0, %v1647_v0 }
 0x140   :  { %1435 = vmatmul.mubr.msk.f32.vlgmr.msra.gmra.mrb[4].mxu1 %vm81_vm1, %v1649_v35  ;;  %1457 = vmatprep.subr.mxu0 %v1647_v0 }
 0x141   :  { %1443 = vmatpush3.xpose.msk.msra.mxu1 %vm81_vm1, %v238_v31  ;;  %1444 = vmatprep.mubr.msk.f32.mxu1 %vm1648_vm0, %v1647_v0 }
 0x142   :  { %1450 = vmatmul.mubr.msk.f32.vlgmr.msra.gmra.mrb[8].mxu0 %vm81_vm1, %v1490_v29  ;;  %1452 = vmatprep.subr.mxu1 %v1647_v0 }
 0x143   :  { %1458 = vmatpush3.xpose.msk.msra.mxu0 %vm158_vm2, %v1805_v36  ;;  %1459 = vmatprep.mubr.msk.f32.mxu0 %vm1648_vm0, %v1647_v0 }
 0x144   :  { %1445 = vmatmul.mubr.msk.f32.vlgmr.msra.gmra.mrb[6].mxu1 %vm81_vm1, %v1649_v35  ;;  %756 = vadd.xlane.f32.xlu0 %v755_v37  ;;  %vm169_vm1 = vcmp.eq.s32.totalorder %v1814_v38, 1 }
 0x145   :  { %1453 = vmatpush3.xpose.msk.msra.mxu1 %vm158_vm2, %v1805_v36  ;;  %1454 = vmatprep.mubr.msk.f32.mxu1 %vm1648_vm0, %v1647_v0  ;;  %vm170_vm3 = vmand %vm169_vm1, %vm165_vm14 }
 0x146   :  { %1460 = vmatmul.mubr.msk.f32.vlgmr.msra.gmra.mrb[10].mxu0 %vm158_vm2, %v1649_v35  ;;  %1462 = vmatprep.subr.mxu1 %v1647_v0 }
 0x147   :  { %1467 = vmatprep.subr.mxu0 %v1647_v0  ;;  %1469 = vmatprep.mubr.msk.f32.mxu0 %vm1648_vm0, %v1647_v0 }
 0x148   :  { %1455 = vmatmul.mubr.msk.f32.vlgmr.msra.gmra.mrb[8].mxu1 %vm158_vm2, %v1805_v36 }
 0x149   :  { %1463 = vmatpush3.xpose.msk.msra.mxu1 %vm158_vm2, %v1805_v36  ;;  %1464 = vmatprep.mubr.msk.f32.mxu1 %vm1648_vm0, %v1647_v0 }
 0x14a   :  { %1472 = vmatprep.subr.mxu1 %v1647_v0 }
 0x14c   :  { %1465 = vmatmul.mubr.msk.f32.vlgmr.msra.gmra.mrb[10].mxu1 %vm158_vm2, %v1841_v40 }
 0x14d   :  { %1474 = vmatprep.mubr.msk.f32.mxu1 %vm1648_vm0, %v1647_v0  ;;  %vm166_vm0 = vmand %vm164_vm15, %vm165_vm14 }
 0x1ca   :  { %v241_v41 = vpop.xlane.xlu0 %240 }
 0x1cb   :  { %1493 = vrsqrt.f32 %v241_v41  ;;  %vm244_vm5 = vcmp.eq.f32.partialorder %v241_v41, inf  ;;  %v247_v3 = vand.u32 2147483648, %v241_v41  ;;  %vm246_vm7 = vcmp.eq.f32.partialorder %v241_v41, 0.0 }
 0x1d1   :  { %v757_v53 = vpop.xlane.xlu0 %756 }
 0x1d5   :  { %v1494_v49 = vpop.eup %1493 }
 0x1d6   :  { %v243_v56 = vmul.f32 %v1494_v49, %v241_v41 }
 0x1d8   :  { %v245_v63 = vsel %vm244_vm5, %v241_v41, %v243_v56 }
 0x1d9   :  { %v248_v9 = vsel %vm246_vm7, %v247_v3, %v245_v63 }
 0x1da   :  { %v459_v14 = vmax.f32 %v248_v9, 1e-08 }
 0x211   :  { %v455_v42 = vpop.f32.mrb[2].mxu0 }
 0x212   :  { %v1441_v43 = vpop.f32.mrb[3].mxu0 }
 0x213   :  { %v372_v44 = vpop.f32.mrb[4].mxu1 }
 0x214   :  { %1495 = vrsqrt.f32 %v372_v44  ;;  %v1436_v45 = vpop.f32.mrb[5].mxu1  ;;  %vm378_vm6 = vcmp.eq.f32.partialorder %v372_v44, inf  ;;  %v381_v4 = vand.u32 2147483648, %v372_v44  ;;  %vm380_vm8 = vcmp.eq.f32.partialorder %v372_v44, 0.0 }
 0x215   :  { %v668_v46 = vpop.f32.mrb[8].mxu0 }
 0x216   :  { %v1451_v47 = vpop.f32.mrb[9].mxu0 }
 0x217   :  { %v588_v48 = vpop.f32.mrb[6].mxu1 }
 0x218   :  { %1497 = vrsqrt.f32 %v588_v48  ;;  %v1446_v51 = vpop.f32.mrb[7].mxu1  ;;  %vm594_vm9 = vcmp.eq.f32.partialorder %v588_v48, inf  ;;  %v597_v13 = vand.u32 2147483648, %v588_v48  ;;  %vm596_vm10 = vcmp.eq.f32.partialorder %v588_v48, 0.0 }
 0x219   :  { %v826_v52 = vpop.f32.mrb[10].mxu0 }
 0x21a   :  { %v833_v54 = vrot.slane %v826_v52, %v463_v50  ;;  %v1461_v55 = vpop.f32.mrb[11].mxu0 }
 0x21b   :  { %v751_v57 = vpop.f32.mrb[8].mxu1 }
 0x21c   :  { %v834_v58 = vadd.f32 %v833_v54, %v757_v53  ;;  %v835_v59 = vmul.f32 2.0, %v751_v57  ;;  %v1456_v60 = vpop.f32.mrb[9].mxu1 }
 0x21e   :  { %v1496_v61 = vpop.eup %1495  ;;  %v836_v62 = vsub.f32 %v834_v58, %v835_v59 }
 0x21f   :  { %v377_v1 = vmul.f32 %v1496_v61, %v372_v44  ;;  %v1849_v2 = vpop.f32.mrb[10].mxu1 }
 0x220   :  { %v1466_v5 = vpop.f32.mrb[11].mxu1  ;;  %v1084_v6 = vsel %vm995_vm4, %v1849_v2, 0.0  ;;  %996 = vst.msk [vmem:[#allocation2] sm:$0xf] %vm995_vm4, %v1849_v2  ;;  %v837_v32 = vmul.f32 0.25, %v836_v62 }
 0x221   :  { %v379_v7 = vsel %vm378_vm6, %v372_v44, %v377_v1  ;;  %1085 = vadd.xlane.f32.xlu0 %v1084_v6 }
 0x222   :  { %v1498_v8 = vpop.eup %1497  ;;  %v382_v10 = vsel %vm380_vm8, %v381_v4, %v379_v7  ;;  %v838_v35 = vsub.f32 1.0, %v837_v32  ;;  %v1340_v32 = vsel %vm166_vm0, 1.0, %v1647_v0 }
 0x223   :  { %v460_v11 = vmax.f32 %v382_v10, 1e-08  ;;  %v593_v12 = vmul.f32 %v1498_v8, %v588_v48 }
 0x225   :  { %v464_v15 = vrot.slane %v460_v11, %v463_v50  ;;  %v595_v16 = vsel %vm594_vm9, %v588_v48, %v593_v12 }
 0x226   :  { %v598_v17 = vsel %vm596_vm10, %v597_v13, %v595_v16 }
 0x227   :  { %v465_v18 = vmul.f32 %v464_v15, %v459_v14  ;;  %v675_v19 = vrot.slane %v598_v17, %v463_v50 }
 0x229   :  { %1499 = vrcp.f32 %v465_v18  ;;  %v676_v20 = vmul.f32 %v675_v19, %v248_v9 }
 0x22b   :  { %v677_v21 = vmax.f32 %v676_v20, 1e-15 }
 0x22d   :  { %1501 = vrcp.f32 %v677_v21 }
 0x233   :  { %v1500_v22 = vpop.eup %1499 }
 0x234   :  { %v467_v23 = vmul.f32 %v1500_v22, %v455_v42  ;;  %v917_v42 = vsub.f32 1.0, %v1849_v2 }
 0x236   :  { %v469_v24 = vmul.f32 20.0, %v467_v23 }
 0x237   :  { %v1502_v25 = vpop.eup %1501 }
 0x238   :  { %v478_v26 = vmul.f32 0.05, %v469_v24  ;;  %v679_v27 = vmul.f32 %v1502_v25, %v668_v46  ;;  %v494_v51 = vmul.f32 1.442695, %v469_v24  ;;  %v473_v58 = vmul.f32 %v1841_v40, %v469_v24 }
 0x23a   :  { %v1350_v28 = vadd.f32 -1.0, %v478_v26  ;;  %v680_v29 = vmul.f32 1.442695, %v679_v27  ;;  %v475_v59 = vsel %vm474_vm11, %v473_v58, 0.0 }
 0x23c   :  { %1503 = vpow2.f32 %v680_v29  ;;  %v480_v30 = vmul.f32 %v1350_v28, %v1350_v28 }
 0x23e   :  { %v481_v31 = vsub.f32 0.0, %v480_v30 }
 0x240   :  { %v483_v33 = vmul.f32 2.0, %v481_v31 }
 0x242   :  { %v484_v34 = vmul.f32 1.442695, %v483_v33 }
 0x244   :  { %1505 = vpow2.f32 %v484_v34 }
 0x246   :  { %v1504_v37 = vpop.eup %1503 }
 0x247   :  { %v1855_v41 = vmul.f32 %v1504_v37, %v838_v35  ;;  %v840_v43 = vmul.f32 %v1504_v37, %v836_v62  ;;  %v1880_v37 = vsel %vm170_vm3, 1.0, %v1647_v0 }
 0x249   :  { %v1001_v44 = vmax.f32 %v1855_v41, 1e-30  ;;  %1468 = vmatpush3.xpose.msk.msra.mxu0 %vm474_vm11, %v840_v43 }
 0x24b   :  { %1507 = vlog2.f32 %v1001_v44 }
 0x24c   :  { %1470 = vmatmul.mubr.msk.f32.vlgmr.msra.gmra.mrb[12].mxu0 %vm474_vm11, %v917_v42 }
 0x24e   :  { %v1506_v45 = vpop.eup %1505 }
 0x24f   :  { %v486_v46 = vmul.f32 0.7978846, %v1506_v45  ;;  %v1650_v45 = vmov (!%p1366_p1), 0.0  }
 0x251   :  { %v487_v47 = vsel %vm474_vm11, %v486_v46, 0.0 }
 0x252   :  { %488 = vadd.xlane.f32.xlu1 %v487_v47 }
 0x255   :  { %v1508_v48 = vpop.eup %1507 }
 0x256   :  { %v1003_v49 = vmul.f32 0.6931472, %v1508_v48 }
 0x258   :  { %1473 = vmatpush3.xpose.msk.msra.mxu1 %vm474_vm11, %v1003_v49 }
 0x25b   :  { %1475 = vmatmul.mubr.msk.f32.vlgmr.msra.gmra.mrb[12].mxu1 %vm474_vm11, %v1849_v2 }
 0x2ae   :  { %v1086_v40 = vpop.xlane.xlu0 %1085 }
 0x2af   :  { %v1088_v9 = vsub.f32 8.0, %v1086_v40  ;;  %v1087_v10 = vmax.f32 %v1086_v40, 1.0  ;;  %vm1090_vm13 = vcmp.gt.f32.partialorder %v1086_v40, 0.5 }
 0x2b1   :  { %v1089_v12 = vadd.f32 1.0, %v1088_v9  ;;  %v1092_v13 = vmul.f32 %v1087_v10, %v1087_v10 }
 0x2df   :  { %v489_v50 = vpop.xlane.xlu1 %488 }
 0x2e0   :  { %v491_v52 = vmul.f32 0.125, %v489_v50 }
 0x2e2   :  { %1509 = vrcp.f32 %v491_v52 }
 0x2e3   :  { %1511 = vpow2.f32 %v494_v51  ;;  %v1369_v51 = vld [vmem:[#allocation2] ss:$0 sm:$0xff] (!%p1366_p1) }
 0x2ec   :  { %v1510_v53 = vpop.eup %1509 }
 0x2ed   :  { %v493_v54 = vmul.f32 %v1510_v53, %v486_v46  ;;  %v1512_v55 = vpop.eup %1511  ;;  %v1367_v46 = vsel (!%p1366_p1), %vm165_vm14, 1.0, %v1650_v45 }
 0x2ee   :  { %v1121_v48 = vmul.f32 (!%p1366_p1), %v1367_v46, %v1805_v36 }
 0x2ef   :  { %v496_v56 = vmul.f32 %v1512_v55, %v493_v54 }
 0x2f0   :  { %v1122_v49 = vsel (!%p1366_p1), %vm158_vm2, %v1121_v48, 0.0 }
 0x2f1   :  { %v497_v57 = vsel %vm474_vm11, %v496_v56, 0.0  ;;  %v1155_v56 = vstv (!%p1366_p1), %s1154_s8 }
 0x2f2   :  { %498 = vadd.xlane.f32.xlu1 %v497_v57 }
 0x2f6   :  { %476 = vadd.xlane.f32.xlu1 %v475_v59 }
 0x31f   :  { %v991_v60 = vpop.f32.mrb[12].mxu0 }
 0x320   :  { %997 = vst.msk [vmem:[#allocation3] sm:$0xf] %vm995_vm4, %v991_v60  ;;  %v1471_v61 = vpop.f32.mrb[13].mxu0 }
 0x327   :  { %v1368_v38 = vld [vmem:[#allocation3] ss:$0 sm:$0xff] (!%p1366_p1) }
 0x328   :  { %v1133_v47 = vadd.f32 (!%p1366_p1), %v1368_v38, %v1855_v41 }
 0x32a   :  { %v1134_v0 = vmax.f32 (!%p1366_p1), %v1133_v47, 1e-30 }
 0x32e   :  { %v1076_v62 = vpop.f32.mrb[12].mxu1 }
 0x32f   :  { %v1080_v63 = vmul.f32 %v1076_v62, %v1849_v2  ;;  %v1476_v1 = vpop.f32.mrb[13].mxu1 }
 0x331   :  { %v1081_v3 = vsel %vm995_vm4, %v1080_v63, 0.0 }
 0x332   :  { %1082 = vadd.xlane.f32.xlu0 %v1081_v3 }
 0x336   :  { %1123 = vadd.xlane.f32.xlu0 (!%p1366_p1), %v1122_v49 }
 0x37f   :  { %v499_v4 = vpop.xlane.xlu1 %498 }
 0x380   :  { %1513 = vlog2.f32 %v499_v4 }
 0x381   :  { %1515 = vlog2.f32 %v1089_v12 }
 0x382   :  { %1517 = vrcp.f32 %v1092_v13 }
 0x383   :  { %v477_v7 = vpop.xlane.xlu1 %476  ;;  %1519 = vlog2.f32 (!%p1366_p1), %v1134_v0 }
 0x384   :  { %1521 = vrcp.f32 (!%p1366_p1), %v1155_v56 }
 0x38a   :  { %v1514_v5 = vpop.eup %1513 }
 0x38b   :  { %v501_v6 = vmul.f32 0.6931472, %v1514_v5  ;;  %v1516_v16 = vpop.eup %1515 }
 0x38c   :  { %v1518_v20 = vpop.eup %1517  ;;  %v1096_v21 = vmul.f32 0.6931472, %v1516_v16 }
 0x38d   :  { %v502_v8 = vsub.f32 %v477_v7, %v501_v6  ;;  %v1520_v50 = vpop.eup (!%p1366_p1), %1519 }
 0x38e   :  { %v1136_v52 = vmul.f32 (!%p1366_p1), 0.6931472, %v1520_v50  ;;  %v1522_v1 = vpop.eup (!%p1366_p1), %1521 }
 0x38f   :  { %v503_v11 = vrot.slane %v502_v8, 4 }
 0x390   :  { %v1141_v53 = vmul.f32 (!%p1366_p1), %v1369_v51, %v1136_v52 }
 0x391   :  { %v504_v14 = vadd.f32 %v503_v11, %v502_v8 }
 0x392   :  { %v1142_v54 = vsel (!%p1366_p1), %vm474_vm11, %v1141_v53, 0.0 }
 0x393   :  { %v505_v2 = vrot.slane %v504_v14, 2  ;;  %1143 = vadd.xlane.f32.xlu0 (!%p1366_p1), %v1142_v54 }
 0x395   :  { %v506_v15 = vadd.f32 %v505_v2, %v504_v14 }
 0x397   :  { %v507_v18 = vrot.slane %v506_v15, 1 }
 0x399   :  { %v508_v23 = vadd.f32 %v507_v18, %v506_v15 }
 0x39b   :  { %v509_v27 = vsub.f32 0.0, %v508_v23 }
 0x39d   :  { %v510_v30 = vmul.f32 0.125, %v509_v27 }
 0x39f   :  { %v512_v34 = vmul.f32 %v1340_v32, %v510_v30 }
 0x3bf   :  { %v1083_v17 = vpop.xlane.xlu0 %1082 }
 0x3c0   :  { %v1091_v19 = vsub.f32 0.0, %v1083_v17 }
 0x3c2   :  { %v1094_v22 = vmul.f32 %v1518_v20, %v1091_v19 }
 0x3c3   :  { %v1124_v55 = vpop.xlane.xlu0 (!%p1366_p1), %1123 }
 0x3c4   :  { %v1097_v24 = vsub.f32 %v1094_v22, %v1096_v21 }
 0x3c6   :  { %v1098_v25 = vsel %vm1090_vm13, %v1097_v24, 0.0 }
 0x3c7   :  { %v1100_v26 = vsel %vm1099_vm12, %v1098_v25, 0.0 }
 0x3c8   :  { %v1101_v28 = vrot.slane %v1100_v26, 4 }
 0x3ca   :  { %v1102_v29 = vadd.f32 %v1101_v28, %v1100_v26 }
 0x3cc   :  { %v1103_v31 = vrot.slane %v1102_v29, 2 }
 0x3ce   :  { %v1104_v33 = vadd.f32 %v1103_v31, %v1102_v29 }
 0x3d0   :  { %v1105_v35 = vrot.slane %v1104_v33, 1 }
 0x3d2   :  { %v1106_v43 = vadd.f32 %v1105_v35, %v1104_v33  ;;  %1116 = sbr.rel (%p1366_p1) target bundleno = 1078 (0x436), region = 53 }
 0x3d4   :  { %v1108_v42 = vmul.f32 %v1880_v37, %v1106_v43 }
 0x3d6   :  { %v1109_v44 = vadd.f32 %v1108_v42, %v512_v34 }
 0x3d8   :  { %1110 = vst [vmem:[#allocation12] sm:$0xff] %v1109_v44 }
 0x3df   :  { %v1153_v5 = vld [vmem:[#allocation12] sm:$0xff] }
 0x420   :  { %v1144_v57 = vpop.xlane.xlu0 %1143 }
 0x421   :  { %v1145_v58 = vmul.f32 %v1144_v57, %v1124_v55 }
 0x423   :  { %v1146_v59 = vrot.slane %v1145_v58, 4 }
 0x425   :  { %v1147_v60 = vadd.f32 %v1146_v59, %v1145_v58 }
 0x427   :  { %v1148_v61 = vrot.slane %v1147_v60, 2 }
 0x429   :  { %v1149_v62 = vadd.f32 %v1148_v61, %v1147_v60 }
 0x42b   :  { %v1150_v63 = vrot.slane %v1149_v62, 1 }
 0x42d   :  { %v1151_v3 = vadd.f32 %v1150_v63, %v1149_v62 }
 0x42f   :  { %v1157_v4 = vmul.f32 %v1522_v1, %v1151_v3 }
 0x431   :  { %v1158_v6 = vmul.f32 %v1880_v37, %v1157_v4 }
 0x433   :  { %v1159_v40 = vadd.f32 %v1158_v6, %v1153_v5 }
 0x435   :  { %1160 = vst [vmem:[#allocation12] sm:$0xff] %v1159_v40 }
 0x436 PF:  { %s1370_s16 = sld [smem:[#allocation5 + $0x1]] }
 0x43c   :  { %p1371_p2 = scmp.le.s32.totalorder %s1370_s16, 0 }
 0x43d   :  { %vm1168_vm4 = vcmp.eq.s32.totalorder (!%p1371_p2), %v1816_v39, 1  ;;  %v1373_v7 = vld [vmem:[#allocation3 + $0x1] ss:$0 sm:$0xff] (!%p1371_p2)  ;;  %v1651_v8 = vmov (!%p1371_p2), 0.0   ;;  %v1374_v2 = vld [vmem:[#allocation2 + $0x1] ss:$0 sm:$0xff] (!%p1371_p2)  ;;  %s1202_s17 = scvt.s32.f32 (!%p1371_p2), %s1370_s16 }
 0x43e   :  { %1166 = sbr.rel (%p1371_p2) target bundleno = 1269 (0x4f5), region = 57  ;;  %v1372_v9 = vsel (!%p1371_p2), %vm1168_vm4, 1.0, %v1651_v8  ;;  %v1183_v10 = vadd.f32 (!%p1371_p2), %v1373_v7, %v1855_v41  ;;  %v1203_v30 = vld [vmem:[#allocation12] sm:$0xff] (!%p1371_p2) }
 0x43f   :  { %v1171_v11 = vmul.f32 (!%p1371_p2), %v1372_v9, %v1805_v36  ;;  %s1204_s18 = smul.f32 (!%p1371_p2), %s1202_s17, %s1202_s17 }
 0x440   :  { %v1184_v12 = vmax.f32 (!%p1371_p2), %v1183_v10, 1e-30 }
 0x441   :  { %v1172_v13 = vsel (!%p1371_p2), %vm158_vm2, %v1171_v11, 0.0  ;;  %v1205_v19 = vstv (!%p1371_p2), %s1204_s18 }
 0x442   :  { %1173 = vadd.xlane.f32.xlu0 (!%p1371_p2), %v1172_v13  ;;  %1523 = vlog2.f32 (!%p1371_p2), %v1184_v12 }
 0x443   :  { %1525 = vrcp.f32 (!%p1371_p2), %v1205_v19 }
 0x44c   :  { %v1524_v14 = vpop.eup %1523 }
 0x44d   :  { %v1186_v15 = vmul.f32 0.6931472, %v1524_v14  ;;  %v1526_v27 = vpop.eup %1525 }
 0x44f   :  { %v1191_v16 = vmul.f32 %v1374_v2, %v1186_v15 }
 0x451   :  { %v1192_v17 = vsel %vm474_vm11, %v1191_v16, 0.0 }
 0x452   :  { %1193 = vadd.xlane.f32.xlu0 %v1192_v17 }
 0x4cf   :  { %v1174_v18 = vpop.xlane.xlu0 %1173 }
 0x4df   :  { %v1194_v20 = vpop.xlane.xlu0 %1193 }
 0x4e0   :  { %v1195_v21 = vmul.f32 %v1194_v20, %v1174_v18 }
 0x4e2   :  { %v1196_v22 = vrot.slane %v1195_v21, 4 }
 0x4e4   :  { %v1197_v23 = vadd.f32 %v1196_v22, %v1195_v21 }
 0x4e6   :  { %v1198_v24 = vrot.slane %v1197_v23, 2 }
 0x4e8   :  { %v1199_v25 = vadd.f32 %v1198_v24, %v1197_v23 }
 0x4ea   :  { %v1200_v26 = vrot.slane %v1199_v25, 1 }
 0x4ec   :  { %v1201_v28 = vadd.f32 %v1200_v26, %v1199_v25 }
 0x4ee   :  { %v1207_v29 = vmul.f32 %v1526_v27, %v1201_v28 }
 0x4f0   :  { %v1208_v31 = vmul.f32 %v1880_v37, %v1207_v29 }
 0x4f2   :  { %v1209_v32 = vadd.f32 %v1208_v31, %v1203_v30 }
 0x4f4   :  { %1210 = vst [vmem:[#allocation12] sm:$0xff] %v1209_v32 }
 0x4f5 PF:  { %s1375_s19 = sld [smem:[#allocation5 + $0x2]] }
 0x4fb   :  { %p1376_p3 = scmp.le.s32.totalorder %s1375_s19, 0 }
 0x4fc   :  { %vm1218_vm5 = vcmp.eq.s32.totalorder (!%p1376_p3), %v1816_v39, 2  ;;  %v1378_v33 = vld [vmem:[#allocation3 + $0x2] ss:$0 sm:$0xff] (!%p1376_p3)  ;;  %v1652_v34 = vmov (!%p1376_p3), 0.0   ;;  %v1379_v46 = vld [vmem:[#allocation2 + $0x2] ss:$0 sm:$0xff] (!%p1376_p3)  ;;  %s1252_s20 = scvt.s32.f32 (!%p1376_p3), %s1375_s19 }
 0x4fd   :  { %1216 = sbr.rel (%p1376_p3) target bundleno = 1460 (0x5b4), region = 61  ;;  %v1377_v35 = vsel (!%p1376_p3), %vm1218_vm5, 1.0, %v1652_v34  ;;  %v1233_v43 = vadd.f32 (!%p1376_p3), %v1378_v33, %v1855_v41  ;;  %v1253_v61 = vld [vmem:[#allocation12] sm:$0xff] (!%p1376_p3) }
 0x4fe   :  { %v1221_v42 = vmul.f32 (!%p1376_p3), %v1377_v35, %v1805_v36  ;;  %s1254_s21 = smul.f32 (!%p1376_p3), %s1252_s20, %s1252_s20 }
 0x4ff   :  { %v1234_v44 = vmax.f32 (!%p1376_p3), %v1233_v43, 1e-30 }
 0x500   :  { %v1222_v38 = vsel (!%p1376_p3), %vm158_vm2, %v1221_v42, 0.0  ;;  %v1255_v50 = vstv (!%p1376_p3), %s1254_s21 }
 0x501   :  { %1223 = vadd.xlane.f32.xlu0 (!%p1376_p3), %v1222_v38  ;;  %1527 = vlog2.f32 (!%p1376_p3), %v1234_v44 }
 0x502   :  { %1529 = vrcp.f32 (!%p1376_p3), %v1255_v50 }
 0x50b   :  { %v1528_v45 = vpop.eup %1527 }
 0x50c   :  { %v1236_v47 = vmul.f32 0.6931472, %v1528_v45  ;;  %v1530_v58 = vpop.eup %1529 }
 0x50e   :  { %v1241_v48 = vmul.f32 %v1379_v46, %v1236_v47 }
 0x510   :  { %v1242_v0 = vsel %vm474_vm11, %v1241_v48, 0.0 }
 0x511   :  { %1243 = vadd.xlane.f32.xlu0 %v1242_v0 }
 0x58e   :  { %v1224_v49 = vpop.xlane.xlu0 %1223 }
 0x59e   :  { %v1244_v51 = vpop.xlane.xlu0 %1243 }
 0x59f   :  { %v1245_v52 = vmul.f32 %v1244_v51, %v1224_v49 }
 0x5a1   :  { %v1246_v53 = vrot.slane %v1245_v52, 4 }
 0x5a3   :  { %v1247_v54 = vadd.f32 %v1246_v53, %v1245_v52 }
 0x5a5   :  { %v1248_v55 = vrot.slane %v1247_v54, 2 }
 0x5a7   :  { %v1249_v56 = vadd.f32 %v1248_v55, %v1247_v54 }
 0x5a9   :  { %v1250_v57 = vrot.slane %v1249_v56, 1 }
 0x5ab   :  { %v1251_v59 = vadd.f32 %v1250_v57, %v1249_v56 }
 0x5ad   :  { %v1257_v60 = vmul.f32 %v1530_v58, %v1251_v59 }
 0x5af   :  { %v1258_v62 = vmul.f32 %v1880_v37, %v1257_v60 }
 0x5b1   :  { %v1259_v63 = vadd.f32 %v1258_v62, %v1253_v61 }
 0x5b3   :  { %1260 = vst [vmem:[#allocation12] sm:$0xff] %v1259_v63 }
 0x5b4 PF:  { %s1380_s22 = sld [smem:[#allocation5 + $0x3]] }
 0x5ba   :  { %p1381_p4 = scmp.le.s32.totalorder %s1380_s22, 0 }
 0x5bb   :  { %vm1268_vm6 = vcmp.eq.s32.totalorder (!%p1381_p4), %v1816_v39, 3  ;;  %v1383_v1 = vld [vmem:[#allocation3 + $0x3] ss:$0 sm:$0xff] (!%p1381_p4)  ;;  %v1653_v3 = vmov (!%p1381_p4), 0.0   ;;  %v1384_v9 = vld [vmem:[#allocation2 + $0x3] ss:$0 sm:$0xff] (!%p1381_p4)  ;;  %s1302_s23 = scvt.s32.f32 (!%p1381_p4), %s1380_s22 }
 0x5bc   :  { %1266 = sbr.rel (%p1381_p4) target bundleno = 1651 (0x673), region = 65  ;;  %v1382_v4 = vsel (!%p1381_p4), %vm1268_vm6, 1.0, %v1653_v3  ;;  %v1283_v5 = vadd.f32 (!%p1381_p4), %v1383_v1, %v1855_v41  ;;  %v1303_v21 = vld [vmem:[#allocation12] sm:$0xff] (!%p1381_p4) }
 0x5bd   :  { %v1271_v6 = vmul.f32 (!%p1381_p4), %v1382_v4, %v1805_v36  ;;  %s1304_s24 = smul.f32 (!%p1381_p4), %s1302_s23, %s1302_s23 }
 0x5be   :  { %v1284_v40 = vmax.f32 (!%p1381_p4), %v1283_v5, 1e-30 }
 0x5bf   :  { %v1272_v7 = vsel (!%p1381_p4), %vm158_vm2, %v1271_v6, 0.0  ;;  %v1305_v13 = vstv (!%p1381_p4), %s1304_s24 }
 0x5c0   :  { %1273 = vadd.xlane.f32.xlu0 (!%p1381_p4), %v1272_v7  ;;  %1531 = vlog2.f32 (!%p1381_p4), %v1284_v40 }
 0x5c1   :  { %1533 = vrcp.f32 (!%p1381_p4), %v1305_v13 }
 0x5ca   :  { %v1532_v8 = vpop.eup %1531 }
 0x5cb   :  { %v1286_v10 = vmul.f32 0.6931472, %v1532_v8  ;;  %v1534_v18 = vpop.eup %1533 }
 0x5cd   :  { %v1291_v11 = vmul.f32 %v1384_v9, %v1286_v10 }
 0x5cf   :  { %v1292_v12 = vsel %vm474_vm11, %v1291_v11, 0.0 }
 0x5d0   :  { %1293 = vadd.xlane.f32.xlu0 %v1292_v12 }
 0x64d   :  { %v1274_v39 = vpop.xlane.xlu0 %1273 }
 0x65d   :  { %v1294_v14 = vpop.xlane.xlu0 %1293 }
 0x65e   :  { %v1295_v41 = vmul.f32 %v1294_v14, %v1274_v39 }
 0x660   :  { %v1296_v36 = vrot.slane %v1295_v41, 4 }
 0x662   :  { %v1297_v2 = vadd.f32 %v1296_v36, %v1295_v41 }
 0x664   :  { %v1298_v15 = vrot.slane %v1297_v2, 2 }
 0x666   :  { %v1299_v16 = vadd.f32 %v1298_v15, %v1297_v2 }
 0x668   :  { %v1300_v17 = vrot.slane %v1299_v16, 1 }
 0x66a   :  { %v1301_v19 = vadd.f32 %v1300_v17, %v1299_v16 }
 0x66c   :  { %v1307_v20 = vmul.f32 %v1534_v18, %v1301_v19 }
 0x66e   :  { %v1308_v22 = vmul.f32 %v1880_v37, %v1307_v20 }
 0x670   :  { %v1309_v23 = vadd.f32 %v1308_v22, %v1303_v21 }
 0x672   :  { %1310 = vst [vmem:[#allocation12] sm:$0xff] %v1309_v23 }
 0x673 PF:  { %s1654_s1 = smov [#allocation12]  }
 0x674   :  { %s1319_s0 = sshll.u32 %s1654_s1, 4  ;;  %s1320_s0 = int_to_ptr.vmem [resolvable:$true] %s1319_s0 }
 0x675   :  { %s1613_s25 = scalar_lea.vmem %s1320_s0, 128  ;;  %p1618_p6 = scmp.lt.s32.totalorder %s1320_s0, %s1320_s0 }
 0x676   :  { %p1614_p5 = scmp.ne.s32.totalorder %s1320_s0, %s1613_s25  ;;  %p1619_p7 = scmp.lt.s32.totalorder %s1613_s25, %s1613_s25 }
 0x678   :  { %p1620_p8 = por %p1619_p7, %p1618_p6 }
 0x67a   :  { %p1621_p9 = pnand %p1620_p8, %p1614_p5 }
 0x67c   :  { %1624 = shalt.err (!%p1621_p9)
}
 0x67d   :  { %s1625_s27 = scalar_lea.hbm %s1931_s9, 128 }
 0x67e   :  { %p1626_p10 = scmp.ne.s32.totalorder %s1931_s9, %s1625_s27  ;;  %p1629_p11 = scmp.lt.u32.totalorder %s1625_s27, %s1931_s9 }
 0x680   :  { %p1631_p12 = pnand %p1629_p11, %p1626_p10 }
 0x682   :  { %1634 = shalt.err (!%p1631_p12)
}
 0x683   :  { %1322 = dma.vmem_to_hbm [thread:$0]  %s1320_s0, 128, %s1931_s9, [#allocation8]  }
 0x684   :  { %1641 = dma.done.wait [#allocation8], 128  }
 0x685   :  { %1642 = vsyncadd [#allocation8], 4294967168 }
 0x686   :  { %1328 = vsyncpa [#allocation7], 1 }
 0x687   :  { %1329 = vsyncpa [#allocation10], 1 }
 0x688   :  { %1330 = vsyncpa [#allocation8], 1 }

</bundles_post_ra>
